<compile_context>
chip_gen: v6e
topology: v6e:2x2x1
jax: 0.10.0
libtpu: 0.0.40
codegen_flags: <defaults>
</compile_context>

<pallas_src>
import jax
import jax.numpy as jnp
import numpy as np
from jax.experimental import pallas as pl
from jax.experimental.pallas import tpu as pltpu

K = 7  # conv kernel size
P = 3  # padding


# ----------------------------------------------------------------------------
# Host-side helpers
# ----------------------------------------------------------------------------
def _conv_as_matmul_operator(weight, C, H, W, dtype=jnp.bfloat16):
    """Build M of shape (2*HW, HW) so that for flattened spatial stats
    out_flat = concat([channel_sum, channel_max], axis=-1) @ M
    reproduces conv2d([mean, max], weight, padding=3).  Zero padding and the
    1/C of the mean are folded into the first HW rows.

    NOTE: uses NumPy on `weight`, so it must run outside any jit trace of
    `weight` (precompute/cache it when `weight` is a traced parameter)."""
    HW = H * W
    w = np.asarray(weight, dtype=np.float32).reshape(2, K, K).copy()
    w[0] *= 1.0 / float(C)  # fold the mean's 1/C into the avg-channel taps

    M = np.zeros((2, HW, HW), dtype=np.float32)
    hh, ww = np.meshgrid(np.arange(H), np.arange(W), indexing="ij")
    out_idx = (hh * W + ww).reshape(-1)
    for dh in range(K):
        for dw in range(K):
            ih = hh + dh - P
            iw = ww + dw - P
            valid = ((ih >= 0) & (ih < H) & (iw >= 0) & (iw < W)).reshape(-1)
            in_idx = (np.clip(ih, 0, H - 1) * W + np.clip(iw, 0, W - 1)).reshape(-1)
            M[0, in_idx[valid], out_idx[valid]] += w[0, dh, dw]
            M[1, in_idx[valid], out_idx[valid]] += w[1, dh, dw]
    # rows [0, HW) -> sum/avg operand, rows [HW, 2*HW) -> max operand
    return jnp.asarray(M.reshape(2 * HW, HW), dtype=dtype)


def _vmem_capacity_bytes():
    try:
        return int(pltpu.get_tpu_info().vmem_capacity_bytes)
    except Exception:
        return 64 << 20  # conservative (v7x per-TC VMEM)


def _num_tensorcores():
    """Best-effort TensorCore-per-chip count (2 on v7x, 1 on v5e/v6e)."""
    try:
        info = pltpu.get_tpu_info()
        for attr in ("num_cores", "core_count", "num_tensorcores",
                     "tensorcore_count"):
            v = getattr(info, attr, None)
            if v:
                return int(v)
    except Exception:
        pass
    try:
        kind = jax.devices()[0].device_kind.lower()
        if "v7" in kind:
            return 2
    except Exception:
        pass
    return 1


def _round_up(v, m):
    return -(-v // m) * m


def _pick_batch_tile(B, C, HW, op_bytes, in_itemsize, out_itemsize,
                     budget_bytes, num_cores):
    """Batch block: multiple of 8, VMEM-budgeted with the operator counted
    once, capped to >= num_cores grid steps only on multi-TC chips."""
    if op_bytes >= budget_bytes:
        # TODO(synk): tiled (TH x TW + 3px halo) banded-operator path for large H*W.
        raise NotImplementedError(
            "dense (2*HW, HW) conv operator does not fit the VMEM budget; "
            "large feature maps need the tiled/banded spatial path")
    per_img = (2 * C * HW * in_itemsize    # double-buffered input block
               + 2 * HW * out_itemsize     # double-buffered output block
               + 8 * HW * 4)               # f32 sum/max + bf16 concat + acc temporaries
    cap_imgs = max(1, (budget_bytes - op_bytes) // per_img)

    bt = _round_up(B, 8)                   # whole (padded) batch in one step if it fits
    if num_cores >= 2 and B > 8:
        # keep >= num_cores grid steps so the "parallel" batch axis shards across TCs
        bt = min(bt, _round_up(-(-B // num_cores), 8))
    bt = min(bt, max(8, (cap_imgs // 8) * 8))   # VMEM cap, multiple of 8
    bt = min(bt, 512)                           # MXU M-fill saturates; keep some grid steps

    if op_bytes + bt * per_img > budget_bytes:
        raise NotImplementedError(
            "per-step VMEM estimate exceeds budget; needs the tiled spatial path")
    return bt


# ----------------------------------------------------------------------------
# Kernel
# ----------------------------------------------------------------------------
def _channel_sum_max(x_ref):
    """Fused channel sum (f32) and max (input dtype) over axis 1 of the
    (Bt, C, HW) VMEM block.  Sublane-group chunks + pairwise tree combine
    avoid per-channel slices and a serial carry chain."""
    Bt, C, HW = x_ref.shape
    if C <= 16:
        x = x_ref[...]
        return jnp.sum(x.astype(jnp.float32), axis=1), jnp.max(x, axis=1)

    ch = 8
    max_chunks = 16
    if -(-C // ch) > max_chunks:                 # cap the static unroll for huge C
        ch = 8 * (-(-C // (8 * max_chunks)))

    parts = []
    c0 = 0
    while c0 < C:                                # static (C is a trace-time constant)
        sz = min(ch, C - c0)
        xc = x_ref[:, pl.ds(c0, sz), :]
        parts.append((jnp.sum(xc.astype(jnp.float32), axis=1),
                      jnp.max(xc, axis=1)))
        c0 += sz

    # Pairwise tree combine -> short dependence chains, independent accumulators.
    while len(parts) > 1:
        nxt = []
        for i in range(0, len(parts) - 1, 2):
            sa, ma = parts[i]
            sb, mb = parts[i + 1]
            nxt.append((sa + sb, jnp.maximum(ma, mb)))
        if len(parts) % 2:
            nxt.append(parts[-1])
        parts = nxt
    return parts[0]


def spatial_attention_kernel(x_ref, op_ref, o_ref):
    # x_ref:  (Bt, C, HW)   VMEM input block, lane-dense spatial axis
    # op_ref: (2*HW, HW)    VMEM fused conv operator (bf16); rows [0,HW) = avg
    #                       taps (1/C folded), rows [HW,2HW) = max taps
    # o_ref:  (Bt, HW)      VMEM output block (dense stores)
    s, m = _channel_sum_max(x_ref)                           # (Bt, HW) each
    sm = jnp.concatenate([s.astype(op_ref.dtype),
                          m.astype(op_ref.dtype)], axis=-1)  # (Bt, 2*HW)
    # Single MXU call; f32 accumulation.
    y = jnp.dot(sm, op_ref[...], preferred_element_type=jnp.float32)
    o_ref[...] = jax.nn.sigmoid(y).astype(o_ref.dtype)


# ----------------------------------------------------------------------------
# Wrapper
# ----------------------------------------------------------------------------
def spatial_attention(x, weight, *, op_dtype=jnp.bfloat16):
    """x: (B, C, H, W); weight: (1, 2, 7, 7) PyTorch OIHW conv weight."""
    B, C, H, W = x.shape
    HW = H * W

    op = _conv_as_matmul_operator(weight, C, H, W, dtype=op_dtype)  # (2*HW, HW)
    op_bytes = int(op.size) * op.dtype.itemsize                     # single-buffered

    cap = _vmem_capacity_bytes()
    budget = int(0.80 * cap)            # ~20% headroom
    vmem_limit = int(0.85 * cap)
    num_cores = _num_tensorcores()

    bt = _pick_batch_tile(B, C, HW, op_bytes, x.dtype.itemsize,
                          x.dtype.itemsize, budget, num_cores)

    # Pad the batch to a multiple of bt instead of shrinking bt.
    Bp = _round_up(B, bt)
    x_flat = x.reshape(B, C, HW)        # free reshape: lane-dense spatial axis
    if Bp != B:
        x_flat = jnp.pad(x_flat, ((0, Bp - B), (0, 0), (0, 0)))
    grid = (Bp // bt,)

    def _run(single_buffer_op):
        op_spec_kwargs = {}
        if single_buffer_op:
            # Constant-index block: don't waste VMEM on a second pipeline buffer.
            op_spec_kwargs["pipeline_mode"] = pl.Buffered(1)
        op_spec = pl.BlockSpec((2 * HW, HW), lambda b: (0, 0), **op_spec_kwargs)
        return pl.pallas_call(
            spatial_attention_kernel,
            out_shape=jax.ShapeDtypeStruct((Bp, HW), x.dtype),
            grid=grid,
            in_specs=[
                pl.BlockSpec((bt, C, HW), lambda b: (b, 0, 0)),
                op_spec,
            ],
            out_specs=pl.BlockSpec((bt, HW), lambda b: (b, 0)),
            compiler_params=pltpu.CompilerParams(
                dimension_semantics=("parallel",),
                vmem_limit_bytes=vmem_limit,
            ),
        )(x_flat, op)

    try:
        out_flat = _run(True)
    except Exception:
        # Fallback if Buffered(1) pipeline mode is unsupported on this build.
        out_flat = _run(False)

    return out_flat[:B].reshape(B, 1, H, W)


# ----------------------------------------------------------------------------
# Pure-JAX reference (mirrors the PyTorch forward)
# ----------------------------------------------------------------------------
def spatial_attention_ref(x, weight):
    avg = jnp.mean(x, axis=1, keepdims=True)
    mx = jnp.max(x, axis=1, keepdims=True)
    cat = jnp.concatenate([avg, mx], axis=1)
    y = jax.lax.conv_general_dilated(
        cat, weight, window_strides=(1, 1), padding=[(P, P), (P, P)],
        dimension_numbers=("NCHW", "OIHW", "NCHW"),
        precision=jax.lax.Precision.HIGHEST)
    return jax.nn.sigmoid(y)


if __name__ == "__main__":
    B, C, H, W = 2, 4, 16, 16
    key = jax.random.PRNGKey(0)
    kx, kw = jax.random.split(key)

    x = jax.random.normal(kx, (B, C, H, W), dtype=jnp.float32)
    # nn.Conv2d(2, 1, kernel_size=7, padding=3, bias=False) weight.
    weight = jax.random.normal(kw, (1, 2, K, K), dtype=jnp.float32) * 0.1

    out = spatial_attention(x, weight)
    jax.block_until_ready(out)

    ref = spatial_attention_ref(x, weight)
    assert out.shape == (B, 1, H, W)
    # bf16 MXU operands (f32 accumulation) vs the HIGHEST-precision reference.
    assert jnp.allclose(out, ref, atol=1e-2, rtol=1e-2), "mismatch vs reference"

    print("KERNEL_OK")
</pallas_src>

<mosaic_0001>
module attributes {stable_mosaic.version = 11 : i64} {
  func.func @spatial_attention_kernel(%arg0: i32, %arg1: memref<8x4x256xf32, #tpu.memory_space<vmem>>, %arg2: memref<512x256xbf16, #tpu.memory_space<vmem>>, %arg3: memref<8x256xf32, #tpu.memory_space<vmem>>) attributes {dimension_semantics = [#tpu.dimension_semantics<parallel>], iteration_bounds = array<i64: 1>, scalar_prefetch = 0 : i64, scratch_operands = 0 : i64, tpu.core_type = #tpu.core_type<tc>, window_params = [{transform_indices = @transform_0, window_bounds = array<i64: 8, 4, 256>}, {pipeline_mode = #tpu.pipeline_mode<synchronous>, transform_indices = @transform_1, window_bounds = array<i64: 512, 256>}, {transform_indices = @transform_2, window_bounds = array<i64: 8, 256>}]} {
    %c0 = arith.constant 0 : index
    %c0_0 = arith.constant 0 : index
    %c0_1 = arith.constant 0 : index
    %0 = vector.load %arg1[%c0, %c0_0, %c0_1] : memref<8x4x256xf32, #tpu.memory_space<vmem>>, vector<8x4x256xf32>
    %cst = arith.constant dense<0.000000e+00> : vector<8x256xf32>
    %1 = vector.multi_reduction <add>, %0, %cst [1] : vector<8x4x256xf32> to vector<8x256xf32>
    %cst_2 = arith.constant dense<0xFF800000> : vector<8x256xf32>
    %2 = vector.multi_reduction <maximumf>, %0, %cst_2 [1] : vector<8x4x256xf32> to vector<8x256xf32>
    %3 = arith.truncf %1 : vector<8x256xf32> to vector<8x256xbf16>
    %4 = arith.truncf %2 : vector<8x256xf32> to vector<8x256xbf16>
    %5 = tpu.concatenate %3, %4 in 1 : vector<8x256xbf16>, vector<8x256xbf16> -> vector<8x512xbf16>
    %c0_3 = arith.constant 0 : index
    %c0_4 = arith.constant 0 : index
    %6 = vector.load %arg2[%c0_3, %c0_4] : memref<512x256xbf16, #tpu.memory_space<vmem>>, vector<512x256xbf16>
    %cst_5 = arith.constant dense<0.000000e+00> : vector<8x256xf32>
    %7 = tpu.matmul %5, %6, %cst_5 {dimension_numbers = #tpu.dot_dimension_numbers<[1], [0], [0], [1], [0, 0, 1, 1], [], []>} : vector<8x512xbf16>, vector<512x256xbf16>, vector<8x256xf32> -> vector<8x256xf32>
    %8 = arith.negf %7 : vector<8x256xf32>
    %9 = math.exp %8 : vector<8x256xf32>
    %cst_6 = arith.constant 1.000000e+00 : f32
    %10 = vector.broadcast %cst_6 : f32 to vector<8x256xf32>
    %11 = arith.addf %10, %9 : vector<8x256xf32>
    %12 = arith.divf %10, %11 : vector<8x256xf32>
    %c0_7 = arith.constant 0 : index
    %c0_8 = arith.constant 0 : index
    %13 = vector.load %arg3[%c0_7, %c0_8] : memref<8x256xf32, #tpu.memory_space<vmem>>, vector<8x256xf32>
    tpu.vector_store %arg3[%c0_7, %c0_8], %12 {strides = array<i32>} : memref<8x256xf32, #tpu.memory_space<vmem>>, vector<8x256xf32>,
    return
  }
  func.func @transform_0(%arg0: i32) -> (i32, i32, i32) {
    %c0_i32 = arith.constant 0 : i32
    %c0_i32_0 = arith.constant 0 : i32
    %c0_i32_1 = arith.constant 0 : i32
    return %arg0, %c0_i32, %c0_i32_0 : i32, i32, i32
  }
  func.func @transform_1(%arg0: i32) -> (i32, i32) {
    %c0_i32 = arith.constant 0 : i32
    %c0_i32_0 = arith.constant 0 : i32
    %c0_i32_1 = arith.constant 0 : i32
    return %c0_i32, %c0_i32_0 : i32, i32
  }
  func.func @transform_2(%arg0: i32) -> (i32, i32) {
    %c0_i32 = arith.constant 0 : i32
    %c0_i32_0 = arith.constant 0 : i32
    return %arg0, %c0_i32 : i32, i32
  }
}

module attributes {stable_mosaic.version = 11 : i64} {
  func.func @spatial_attention_kernel(%arg0: i32, %arg1: memref<8x4x256xf32, #tpu.memory_space<vmem>>, %arg2: memref<512x256xbf16, #tpu.memory_space<vmem>>, %arg3: memref<8x256xf32, #tpu.memory_space<vmem>>) attributes {dimension_semantics = [#tpu.dimension_semantics<parallel>], iteration_bounds = array<i64: 1>, scalar_prefetch = 0 : i64, scratch_operands = 0 : i64, tpu.core_type = #tpu.core_type<tc>, window_params = [{transform_indices = @transform_0, window_bounds = array<i64: 8, 4, 256>}, {pipeline_mode = #tpu.pipeline_mode<synchronous>, transform_indices = @transform_1, window_bounds = array<i64: 512, 256>}, {transform_indices = @transform_2, window_bounds = array<i64: 8, 256>}]} {
    %c0 = arith.constant 0 : index
    %c0_0 = arith.constant 0 : index
    %c0_1 = arith.constant 0 : index
    %0 = vector.load %arg1[%c0, %c0_0, %c0_1] : memref<8x4x256xf32, #tpu.memory_space<vmem>>, vector<8x4x256xf32>
    %cst = arith.constant dense<0.000000e+00> : vector<8x256xf32>
    %1 = vector.multi_reduction <add>, %0, %cst [1] : vector<8x4x256xf32> to vector<8x256xf32>
    %cst_2 = arith.constant dense<0xFF800000> : vector<8x256xf32>
    %2 = vector.multi_reduction <maximumf>, %0, %cst_2 [1] : vector<8x4x256xf32> to vector<8x256xf32>
    %3 = arith.truncf %1 : vector<8x256xf32> to vector<8x256xbf16>
    %4 = arith.truncf %2 : vector<8x256xf32> to vector<8x256xbf16>
    %5 = tpu.concatenate %3, %4 in 1 : vector<8x256xbf16>, vector<8x256xbf16> -> vector<8x512xbf16>
    %c0_3 = arith.constant 0 : index
    %c0_4 = arith.constant 0 : index
    %6 = vector.load %arg2[%c0_3, %c0_4] : memref<512x256xbf16, #tpu.memory_space<vmem>>, vector<512x256xbf16>
    %cst_5 = arith.constant dense<0.000000e+00> : vector<8x256xf32>
    %7 = tpu.matmul %5, %6, %cst_5 {dimension_numbers = #tpu.dot_dimension_numbers<[1], [0], [0], [1], [0, 0, 1, 1], [], []>} : vector<8x512xbf16>, vector<512x256xbf16>, vector<8x256xf32> -> vector<8x256xf32>
    %8 = arith.negf %7 : vector<8x256xf32>
    %9 = math.exp %8 : vector<8x256xf32>
    %cst_6 = arith.constant 1.000000e+00 : f32
    %10 = vector.broadcast %cst_6 : f32 to vector<8x256xf32>
    %11 = arith.addf %10, %9 : vector<8x256xf32>
    %12 = arith.divf %10, %11 : vector<8x256xf32>
    %c0_7 = arith.constant 0 : index
    %c0_8 = arith.constant 0 : index
    %13 = vector.load %arg3[%c0_7, %c0_8] : memref<8x256xf32, #tpu.memory_space<vmem>>, vector<8x256xf32>
    tpu.vector_store %arg3[%c0_7, %c0_8], %12 {strides = array<i32>} : memref<8x256xf32, #tpu.memory_space<vmem>>, vector<8x256xf32>,
    return
  }
  func.func @transform_0(%arg0: i32) -> (i32, i32, i32) {
    %c0_i32 = arith.constant 0 : i32
    %c0_i32_0 = arith.constant 0 : i32
    %c0_i32_1 = arith.constant 0 : i32
    return %arg0, %c0_i32, %c0_i32_0 : i32, i32, i32
  }
  func.func @transform_1(%arg0: i32) -> (i32, i32) {
    %c0_i32 = arith.constant 0 : i32
    %c0_i32_0 = arith.constant 0 : i32
    %c0_i32_1 = arith.constant 0 : i32
    return %c0_i32, %c0_i32_0 : i32, i32
  }
  func.func @transform_2(%arg0: i32) -> (i32, i32) {
    %c0_i32 = arith.constant 0 : i32
    %c0_i32_0 = arith.constant 0 : i32
    return %arg0, %c0_i32 : i32, i32
  }
}

</mosaic_0001>

<bundles_post_ra>
// kernel: tpu_custom_call.1
= control target key start
LH: loop header
LB: loop body
LE: loop exit
PB: predicated region body
PF: predicated region fallthrough
CT: control target
= control target key end

     0   :  { %7 = vsyncpa [#allocation3], 0  ;;  %s1354_s0 = inlined_call_operand.hbm [shape: f32[8,4,256], index: 0, kind: input, shape index: {}]   ;;  %s1355_s1 = inlined_call_operand.hbm [shape: bf16[512,256], index: 1, kind: input, shape index: {}]   ;;  %s1356_s2 = inlined_call_operand.hbm [shape: f32[8,256], index: 2, kind: output, shape index: {}]  }
   0x1   :  { %8 = vsyncpa [#allocation6], 0 }
   0x2   :  { %9 = vsyncpa [#allocation4], 0  ;;  %s1181_s9 = smov [#allocation2]  }
   0x3   :  { %s15_s10 = sshll.u32 %s1181_s9, 4  ;;  %s16_s10 = int_to_ptr.vmem [resolvable:$true] %s15_s10 }
   0x4   :  { %s1123_s11 = scalar_lea.vmem %s16_s10, 1024  ;;  %p1128_p1 = scmp.lt.s32.totalorder %s16_s10, %s16_s10 }
   0x5   :  { %p1124_p0 = scmp.ne.s32.totalorder %s16_s10, %s1123_s11  ;;  %p1129_p2 = scmp.lt.s32.totalorder %s1123_s11, %s1123_s11 }
   0x7   :  { %p1130_p3 = por %p1129_p2, %p1128_p1 }
   0x9   :  { %p1131_p4 = pnand %p1130_p3, %p1124_p0 }
   0xb   :  { %1134 = shalt.err (!%p1131_p4)
}
   0xc   :  { %s1182_s12 = smov 128   ;;  %s1183_s13 = smov 8  }
   0xd   :  { %21 = dma.hbm_to_vmem [thread:$0]  %s1354_s0, 1024, %s16_s10, [#allocation3], %s1182_s12, %s1182_s12, %s1183_s13  }
   0xe   :  { %s1184_s16 = smov [#allocation5]  }
   0xf   :  { %s27_s17 = sshll.u32 %s1184_s16, 4  ;;  %s28_s17 = int_to_ptr.vmem [resolvable:$true] %s27_s17 }
  0x10   :  { %s1143_s18 = scalar_lea.vmem %s28_s17, 8192  ;;  %p1148_p6 = scmp.lt.s32.totalorder %s28_s17, %s28_s17 }
  0x11   :  { %p1144_p5 = scmp.ne.s32.totalorder %s28_s17, %s1143_s18  ;;  %p1149_p7 = scmp.lt.s32.totalorder %s1143_s18, %s1143_s18 }
  0x13   :  { %p1150_p8 = por %p1149_p7, %p1148_p6 }
  0x15   :  { %p1151_p9 = pnand %p1150_p8, %p1144_p5 }
  0x17   :  { %1154 = shalt.err (!%p1151_p9)
}
  0x18   :  { %33 = dma.hbm_to_vmem [thread:$0]  %s1355_s1, 8192, %s28_s17, [#allocation6], %s1182_s12, %s1182_s12, %s1183_s13  }
  0x19   :  { %1175 = dma.done.wait [#allocation3], 1024  }
  0x1a   :  { %1176 = vsyncadd [#allocation3], 4294966272 }
  0x1b   :  { %1177 = dma.done.wait [#allocation6], 8192  }
  0x1c   :  { %1178 = vsyncadd [#allocation6], 4294959104  ;;  %v1003_v0 = vld [vmem:[#allocation5 + $0x74] ss:$8 sps:$4 sm:$0xff]   ;;  %v1007_v2 = vld [vmem:[#allocation5 + $0x70] ss:$8 sps:$4 sm:$0xff]  }
  0x1d   :  { %v1005_v1 = vld [vmem:[#allocation5 + $0x174] ss:$8 sps:$4 sm:$0xff]   ;;  %820 = vmatprep.subr.bf16.mxu0 %v1003_v0  ;;  %v1008_v3 = vld [vmem:[#allocation5 + $0x170] ss:$8 sps:$4 sm:$0xff]   ;;  %v1009_v4 = vld [vmem:[#allocation5 + $0x64] ss:$8 sps:$4 sm:$0xff]  }
  0x1e   :  { %861 = vmatprep.subr.bf16.mxu1 %v1005_v1  ;;  %821 = vmatpush1.bf16.msra.mxu0 %v1007_v2  ;;  %v1011_v5 = vld [vmem:[#allocation5 + $0x164] ss:$8 sps:$4 sm:$0xff]   ;;  %v1013_v6 = vld [vmem:[#allocation5 + $0x60] ss:$8 sps:$4 sm:$0xff]   ;;  %v1015_v8 = vld [vmem:[#allocation5 + $0x54] ss:$8 sps:$4 sm:$0xff]  }
  0x1f   :  { %862 = vmatpush1.bf16.msra.mxu1 %v1008_v3  ;;  %822 = vmatprep.subr.bf16.mxu0 %v1009_v4  ;;  %v1014_v7 = vld [vmem:[#allocation5 + $0x160] ss:$8 sps:$4 sm:$0xff]   ;;  %v1017_v9 = vld [vmem:[#allocation5 + $0x154] ss:$8 sps:$4 sm:$0xff]   ;;  %v1019_v10 = vld [vmem:[#allocation5 + $0x50] ss:$8 sps:$4 sm:$0xff]  }
  0x20   :  { %863 = vmatprep.subr.bf16.mxu1 %v1011_v5  ;;  %v1020_v11 = vld [vmem:[#allocation5 + $0x150] ss:$8 sps:$4 sm:$0xff]   ;;  %v1021_v12 = vld [vmem:[#allocation5 + $0x44] ss:$8 sps:$4 sm:$0xff]   ;;  %v1025_v14 = vld [vmem:[#allocation5 + $0x40] ss:$8 sps:$4 sm:$0xff]  }
  0x21   :  { %v1023_v13 = vld [vmem:[#allocation5 + $0x144] ss:$8 sps:$4 sm:$0xff]   ;;  %v1026_v15 = vld [vmem:[#allocation5 + $0x140] ss:$8 sps:$4 sm:$0xff]   ;;  %v1027_v16 = vld [vmem:[#allocation5 + $0x34] ss:$8 sps:$4 sm:$0xff]  }
  0x22   :  { %823 = vmatpush1.bf16.msra.mxu0 %v1013_v6  ;;  %v1029_v17 = vld [vmem:[#allocation5 + $0x134] ss:$8 sps:$4 sm:$0xff]   ;;  %v1031_v18 = vld [vmem:[#allocation5 + $0x30] ss:$8 sps:$4 sm:$0xff]   ;;  %v1033_v20 = vld [vmem:[#allocation5 + $0x24] ss:$8 sps:$4 sm:$0xff]  }
  0x23   :  { %864 = vmatpush1.bf16.msra.mxu1 %v1014_v7  ;;  %824 = vmatprep.subr.bf16.mxu0 %v1015_v8  ;;  %v1032_v19 = vld [vmem:[#allocation5 + $0x130] ss:$8 sps:$4 sm:$0xff]   ;;  %v1035_v21 = vld [vmem:[#allocation5 + $0x124] ss:$8 sps:$4 sm:$0xff]   ;;  %v1037_v22 = vld [vmem:[#allocation5 + $0x20] ss:$8 sps:$4 sm:$0xff]  }
  0x24   :  { %865 = vmatprep.subr.bf16.mxu1 %v1017_v9  ;;  %v1038_v23 = vld [vmem:[#allocation5 + $0x120] ss:$8 sps:$4 sm:$0xff]   ;;  %v1039_v24 = vld [vmem:[#allocation5 + $0x14] ss:$8 sps:$4 sm:$0xff]   ;;  %v1043_v26 = vld [vmem:[#allocation5 + $0x10] ss:$8 sps:$4 sm:$0xff]  }
  0x25   :  { %v1041_v25 = vld [vmem:[#allocation5 + $0x114] ss:$8 sps:$4 sm:$0xff]   ;;  %v1044_v27 = vld [vmem:[#allocation5 + $0x110] ss:$8 sps:$4 sm:$0xff]   ;;  %v1045_v28 = vld [vmem:[#allocation5 + $0x4] ss:$8 sps:$4 sm:$0xff]  }
  0x26   :  { %825 = vmatpush1.bf16.msra.mxu0 %v1019_v10  ;;  %v1047_v29 = vld [vmem:[#allocation5 + $0x104] ss:$8 sps:$4 sm:$0xff]   ;;  %v1049_v30 = vld [vmem:[#allocation5] ss:$8 sps:$4 sm:$0xff]   ;;  %v1051_v32 = vld [vmem:[#allocation5 + $0xf4] ss:$8 sps:$4 sm:$0xff]  }
  0x27   :  { %866 = vmatpush1.bf16.msra.mxu1 %v1020_v11  ;;  %826 = vmatprep.subr.bf16.mxu0 %v1021_v12  ;;  %v1050_v31 = vld [vmem:[#allocation5 + $0x100] ss:$8 sps:$4 sm:$0xff]   ;;  %v1053_v33 = vld [vmem:[#allocation5 + $0x1f4] ss:$8 sps:$4 sm:$0xff]   ;;  %v1055_v34 = vld [vmem:[#allocation5 + $0xf0] ss:$8 sps:$4 sm:$0xff]  }
  0x28   :  { %867 = vmatprep.subr.bf16.mxu1 %v1023_v13  ;;  %v1056_v35 = vld [vmem:[#allocation5 + $0x1f0] ss:$8 sps:$4 sm:$0xff]   ;;  %v1057_v36 = vld [vmem:[#allocation5 + $0xe4] ss:$8 sps:$4 sm:$0xff]   ;;  %v1061_v38 = vld [vmem:[#allocation5 + $0xe0] ss:$8 sps:$4 sm:$0xff]  }
  0x29   :  { %v1059_v37 = vld [vmem:[#allocation5 + $0x1e4] ss:$8 sps:$4 sm:$0xff]   ;;  %v1062_v39 = vld [vmem:[#allocation5 + $0x1e0] ss:$8 sps:$4 sm:$0xff]   ;;  %v1063_v40 = vld [vmem:[#allocation5 + $0xd4] ss:$8 sps:$4 sm:$0xff]  }
  0x2a   :  { %827 = vmatpush1.bf16.msra.mxu0 %v1025_v14  ;;  %v1065_v41 = vld [vmem:[#allocation5 + $0x1d4] ss:$8 sps:$4 sm:$0xff]   ;;  %v1067_v42 = vld [vmem:[#allocation5 + $0xd0] ss:$8 sps:$4 sm:$0xff]   ;;  %v1069_v44 = vld [vmem:[#allocation5 + $0xc4] ss:$8 sps:$4 sm:$0xff]  }
  0x2b   :  { %868 = vmatpush1.bf16.msra.mxu1 %v1026_v15  ;;  %828 = vmatprep.subr.bf16.mxu0 %v1027_v16  ;;  %v1068_v43 = vld [vmem:[#allocation5 + $0x1d0] ss:$8 sps:$4 sm:$0xff]   ;;  %vm72_vm0 = vcmask 1043456   ;;  %v1071_v45 = vld [vmem:[#allocation5 + $0x1c4] ss:$8 sps:$4 sm:$0xff]   ;;  %vm361_vm1 = vcmask 1041409  }
  0x2c   :  { %869 = vmatprep.subr.bf16.mxu1 %v1029_v17  ;;  %v1073_v46 = vld [vmem:[#allocation5 + $0xc0] ss:$8 sps:$4 sm:$0xff]   ;;  %v1209_v50 = vld [vmem:[#allocation2 + $0x10] sm:$0xff]  ;;  %v1211_v51 = vld [vmem:[#allocation2 + $0x18] sm:$0xff]  ;;  %vm363_vm2 = vcmask 1042434   ;;  %vm365_vm3 = vcmask 1043459  }
  0x2d   :  { %v1074_v47 = vld [vmem:[#allocation5 + $0x1c0] ss:$8 sps:$4 sm:$0xff]   ;;  %v1225_v57 = vld [vmem:[#allocation2 + $0x30] sm:$0xff]  ;;  %v1233_v59 = vcombine.high %v1209_v50, %v1209_v50  ;;  %v1237_v60 = vcombine.high %v1211_v51, %v1211_v51  ;;  %v1240_v0 = vld [vmem:[#allocation2 + $0x38] sm:$0xff]  ;;  %vm367_vm4 = vcmask 1044484   ;;  %vm369_vm5 = vcmask 1045509  }
  0x2e   :  { %829 = vmatpush1.bf16.msra.mxu0 %v1031_v18  ;;  %v40_v48 = vld [vmem:[#allocation2] sm:$0xff]  ;;  %v1207_v49 = vld [vmem:[#allocation2 + $0x8] sm:$0xff]  ;;  %v1075_v62 = vld [vmem:[#allocation5 + $0xb4] ss:$8 sps:$4 sm:$0xff]   ;;  %v1252_v3 = vcombine.high %v1225_v57, %v1225_v57  ;;  %v1258_v5 = vcombine.high %v1240_v0, %v1240_v0  ;;  %vm371_vm6 = vcmask 1046534   ;;  %vm373_vm7 = vcmask 1047559  }
  0x2f   :  { %870 = vmatpush1.bf16.msra.mxu1 %v1032_v19  ;;  %830 = vmatprep.subr.bf16.mxu0 %v1033_v20  ;;  %v1213_v52 = vcombine.high %v40_v48, %v40_v48  ;;  %v1216_v53 = vsel %vm72_vm0, %v40_v48, 0.0  ;;  %v1219_v54 = vsel %vm72_vm0, %v40_v48, -inf  ;;  %v1221_v55 = vld [vmem:[#allocation2 + $0x20] sm:$0xff]  ;;  %v1223_v56 = vld [vmem:[#allocation2 + $0x28] sm:$0xff]  ;;  %v1229_v58 = vcombine.high %v1207_v49, %v1207_v49  ;;  %v1077_v63 = vld [vmem:[#allocation5 + $0x1b4] ss:$8 sps:$4 sm:$0xff]  }
  0x30   :  { %871 = vmatprep.subr.bf16.mxu1 %v1035_v21  ;;  %v74_v61 = vrot.slane %v1216_v53, 4  ;;  %v1244_v1 = vcombine.high %v1221_v55, %v1221_v55  ;;  %v1248_v2 = vcombine.high %v1223_v56, %v1223_v56  ;;  %v108_v8 = vsel %vm72_vm0, %v1233_v59, 0.0  ;;  %v1079_v9 = vld [vmem:[#allocation5 + $0xb0] ss:$8 sps:$4 sm:$0xff]   ;;  %v1081_v19 = vld [vmem:[#allocation5 + $0xa4] ss:$8 sps:$4 sm:$0xff]  }
  0x31   :  { %v80_v4 = vsel %vm72_vm0, %v1213_v52, 0.0  ;;  %v94_v7 = vsel %vm72_vm0, %v1229_v58, 0.0  ;;  %v109_v11 = vrot.slane %v108_v8, 4  ;;  %v122_v12 = vsel %vm72_vm0, %v1237_v60, 0.0  ;;  %v1080_v14 = vld [vmem:[#allocation5 + $0x1b0] ss:$8 sps:$4 sm:$0xff]  }
  0x32   :  { %831 = vmatpush1.bf16.msra.mxu0 %v1037_v22  ;;  %v81_v6 = vrot.slane %v80_v4, 4  ;;  %v95_v10 = vrot.slane %v94_v7, 4  ;;  %v136_v13 = vsel %vm72_vm0, %v1244_v1, 0.0  ;;  %v123_v16 = vrot.slane %v122_v12, 4  ;;  %v1083_v20 = vld [vmem:[#allocation5 + $0x1a4] ss:$8 sps:$4 sm:$0xff]  }
  0x33   :  { %872 = vmatpush1.bf16.msra.mxu1 %v1038_v23  ;;  %832 = vmatprep.subr.bf16.mxu0 %v1039_v24  ;;  %v137_v17 = vrot.slane %v136_v13, 4  ;;  %v150_v18 = vsel %vm72_vm0, %v1248_v2, 0.0  ;;  %v110_v22 = vadd.f32 %v109_v11, %v108_v8  ;;  %v164_v24 = vsel %vm72_vm0, %v1252_v3, 0.0  ;;  %v1092_v8 = vld [vmem:[#allocation5 + $0x190] ss:$8 sps:$4 sm:$0xff]   ;;  %s1185_s0 = smov [#allocation7]  }
  0x34   :  { %873 = vmatprep.subr.bf16.mxu1 %v1041_v25  ;;  %v82_v15 = vadd.f32 %v81_v6, %v80_v4  ;;  %v96_v21 = vadd.f32 %v95_v10, %v94_v7  ;;  %v151_v23 = vrot.slane %v150_v18, 4  ;;  %v1091_v7 = vld [vmem:[#allocation5 + $0x90] ss:$8 sps:$4 sm:$0xff]   ;;  %s922_s1 = sshll.u32 %s1185_s0, 4  ;;  %s923_s1 = int_to_ptr.vmem [resolvable:$true] %s922_s1 }
  0x35   :  { %s1155_s21 = scalar_lea.vmem %s923_s1, 256  ;;  %p1160_p11 = scmp.lt.s32.totalorder %s923_s1, %s923_s1 }
  0x36   :  { %833 = vmatpush1.bf16.msra.mxu0 %v1043_v26  ;;  %v83_v25 = vrot.slane %v82_v15, 2  ;;  %v124_v26 = vadd.f32 %v123_v16, %v122_v12  ;;  %p1156_p10 = scmp.ne.s32.totalorder %s923_s1, %s1155_s21  ;;  %p1161_p12 = scmp.lt.s32.totalorder %s1155_s21, %s1155_s21 }
  0x37   :  { %874 = vmatpush1.bf16.msra.mxu1 %v1044_v27  ;;  %834 = vmatprep.subr.bf16.mxu0 %v1045_v28  ;;  %v138_v27 = vadd.f32 %v137_v17, %v136_v13  ;;  %v165_v28 = vrot.slane %v164_v24, 4  ;;  %v1093_v13 = vld [vmem:[#allocation5 + $0x84] ss:$8 sps:$4 sm:$0xff]  }
  0x38   :  { %875 = vmatprep.subr.bf16.mxu1 %v1047_v29  ;;  %v97_v29 = vrot.slane %v96_v21, 2  ;;  %p1162_p13 = por %p1161_p12, %p1160_p11 }
  0x3a   :  { %835 = vmatpush1.bf16.msra.mxu0 %v1049_v30  ;;  %v111_v30 = vrot.slane %v110_v22, 2  ;;  %p1163_p0 = pnand %p1162_p13, %p1156_p10 }
  0x3b   :  { %876 = vmatpush1.bf16.msra.mxu1 %v1050_v31  ;;  %836 = vmatprep.subr.bf16.mxu0 %v1051_v32  ;;  %v152_v31 = vadd.f32 %v151_v23, %v150_v18  ;;  %v178_v32 = vsel %vm72_vm0, %v1258_v5, 0.0 }
  0x3c   :  { %877 = vmatprep.subr.bf16.mxu1 %v1053_v33  ;;  %v1085_v33 = vld [vmem:[#allocation5 + $0xa0] ss:$8 sps:$4 sm:$0xff]  }
  0x3e   :  { %837 = vmatpush2.bf16.msra.mxu0 %v1055_v34  ;;  %v1086_v34 = vld [vmem:[#allocation5 + $0x1a0] ss:$8 sps:$4 sm:$0xff]  }
  0x3f   :  { %878 = vmatpush2.bf16.msra.mxu1 %v1056_v35  ;;  %838 = vmatprep.subr.bf16.mxu0 %v1057_v36  ;;  %v84_v35 = vadd.f32 %v83_v25, %v82_v15  ;;  %v125_v36 = vrot.slane %v124_v26, 2 }
  0x40   :  { %879 = vmatprep.subr.bf16.mxu1 %v1059_v37  ;;  %v139_v37 = vrot.slane %v138_v27, 2 }
  0x42   :  { %839 = vmatpush2.bf16.msra.mxu0 %v1061_v38  ;;  %v166_v38 = vadd.f32 %v165_v28, %v164_v24  ;;  %v1098_v28 = vld [vmem:[#allocation5 + $0x180] ss:$8 sps:$4 sm:$0xff]  }
  0x43   :  { %880 = vmatpush2.bf16.msra.mxu1 %v1062_v39  ;;  %840 = vmatprep.subr.bf16.mxu0 %v1063_v40  ;;  %v1087_v39 = vld [vmem:[#allocation5 + $0x94] ss:$8 sps:$4 sm:$0xff]  }
  0x44   :  { %881 = vmatprep.subr.bf16.mxu1 %v1065_v41  ;;  %v1089_v40 = vld [vmem:[#allocation5 + $0x194] ss:$8 sps:$4 sm:$0xff]   ;;  %v98_v41 = vadd.f32 %v97_v29, %v96_v21  ;;  %v167_v48 = vrot.slane %v166_v38, 2 }
  0x46   :  { %841 = vmatpush2.bf16.msra.mxu0 %v1067_v42  ;;  %v112_v42 = vadd.f32 %v111_v30, %v110_v22  ;;  %v168_v12 = vadd.f32 %v167_v48, %v166_v38  ;;  %v220_v48 = vsel %vm72_vm0, %v1233_v59, -inf }
  0x47   :  { %882 = vmatpush2.bf16.msra.mxu1 %v1068_v43  ;;  %842 = vmatprep.subr.bf16.mxu0 %v1069_v44  ;;  %v153_v43 = vrot.slane %v152_v31, 2  ;;  %v179_v44 = vrot.slane %v178_v32, 4 }
  0x48   :  { %883 = vmatprep.subr.bf16.mxu1 %v1071_v45  ;;  %v85_v45 = vrot.slane %v84_v35, 1  ;;  %v169_v21 = vrot.slane %v168_v12, 1 }
  0x49   :  { %v154_v4 = vadd.f32 %v153_v43, %v152_v31  ;;  %v180_v6 = vadd.f32 %v179_v44, %v178_v32 }
  0x4a   :  { %843 = vmatpush2.bf16.msra.mxu0 %v1073_v46  ;;  %v126_v46 = vadd.f32 %v125_v36, %v124_v26  ;;  %v170_v29 = vadd.f32 %v169_v21, %v168_v12 }
  0x4b   :  { %884 = vmatpush2.bf16.msra.mxu1 %v1074_v47  ;;  %844 = vmatprep.subr.bf16.mxu0 %v1075_v62  ;;  %v140_v47 = vadd.f32 %v139_v37, %v138_v27  ;;  %v99_v62 = vrot.slane %v98_v41, 1  ;;  %v155_v17 = vrot.slane %v154_v4, 1  ;;  %v181_v18 = vrot.slane %v180_v6, 2  ;;  %v1097_v27 = vld [vmem:[#allocation5 + $0x80] ss:$8 sps:$4 sm:$0xff]  }
  0x4c   :  { %885 = vmatprep.subr.bf16.mxu1 %v1077_v63  ;;  %v113_v63 = vrot.slane %v112_v42, 1  ;;  %v127_v10 = vrot.slane %v126_v46, 1  ;;  %v310_v37 = vpack.c.bf16 %v170_v29, %v170_v29 }
  0x4d   :  { %v141_v11 = vrot.slane %v140_v47, 1  ;;  %v100_v15 = vadd.f32 %v99_v62, %v98_v41  ;;  %v156_v23 = vadd.f32 %v155_v17, %v154_v4  ;;  %v182_v24 = vadd.f32 %v181_v18, %v180_v6 }
  0x4e   :  { %845 = vmatpush2.bf16.msra.mxu0 %v1079_v9  ;;  %v86_v9 = vadd.f32 %v85_v45, %v84_v35  ;;  %v114_v16 = vadd.f32 %v113_v63, %v112_v42  ;;  %v358_v45 = vunpack.c.l.b16 %v310_v37 }
  0x4f   :  { %886 = vmatpush2.bf16.msra.mxu1 %v1080_v14  ;;  %846 = vmatprep.subr.bf16.mxu0 %v1081_v19  ;;  %v1095_v14 = vld [vmem:[#allocation5 + $0x184] ss:$8 sps:$4 sm:$0xff]   ;;  %v128_v19 = vadd.f32 %v127_v10, %v126_v46  ;;  %v300_v25 = vpack.c.bf16 %v100_v15, %v100_v15 }
  0x50   :  { %887 = vmatprep.subr.bf16.mxu1 %v1083_v20  ;;  %v142_v20 = vadd.f32 %v141_v11, %v140_v47  ;;  %v298_v22 = vpack.c.bf16 %v86_v9, %v86_v9  ;;  %v302_v26 = vpack.c.bf16 %v114_v16, %v114_v16  ;;  %v206_v47 = vsel %vm72_vm0, %v1229_v58, -inf }
  0x51   :  { %v304_v30 = vpack.c.bf16 %v128_v19, %v128_v19  ;;  %v348_v35 = vunpack.c.l.b16 %v300_v25  ;;  %v207_v4 = vrot.slane %v206_v47, 4  ;;  %v248_v9 = vsel %vm72_vm0, %v1244_v1, -inf }
  0x52   :  { %847 = vmatpush2.bf16.msra.mxu0 %v1085_v33  ;;  %v306_v31 = vpack.c.bf16 %v142_v20, %v142_v20  ;;  %v346_v32 = vunpack.c.l.b16 %v298_v22  ;;  %v183_v33 = vrot.slane %v182_v24, 1  ;;  %v350_v36 = vunpack.c.l.b16 %v302_v26 }
  0x53   :  { %888 = vmatpush2.bf16.msra.mxu1 %v1086_v34  ;;  %848 = vmatprep.subr.bf16.mxu0 %v1087_v39  ;;  %v308_v34 = vpack.c.bf16 %v156_v23, %v156_v23  ;;  %v352_v38 = vunpack.c.l.b16 %v304_v30  ;;  %v208_v12 = vmax.f32 %v206_v47, %v207_v4  ;;  %v249_v15 = vrot.slane %v248_v9, 4 }
  0x54   :  { %889 = vmatprep.subr.bf16.mxu1 %v1089_v40  ;;  %v354_v39 = vunpack.c.l.b16 %v306_v31  ;;  %v192_v40 = vsel %vm72_vm0, %v1213_v52, -inf  ;;  %v184_v41 = vadd.f32 %v183_v33, %v182_v24  ;;  %v375_v43 = vsel %vm361_vm1, %v348_v35, %v346_v32 }
  0x55   :  { %v356_v42 = vunpack.c.l.b16 %v308_v34  ;;  %v193_v44 = vrot.slane %v192_v40, 4  ;;  %v376_v46 = vsel %vm363_vm2, %v350_v36, %v375_v43  ;;  %v209_v18 = vrot.slane %v208_v12, 2 }
  0x56   :  { %849 = vmatpush2.bf16.msra.mxu0 %v1091_v7  ;;  %v312_v62 = vpack.c.bf16 %v184_v41, %v184_v41  ;;  %v377_v63 = vsel %vm365_vm3, %v352_v38, %v376_v46  ;;  %v221_v7 = vrot.slane %v220_v48, 4  ;;  %v250_v21 = vmax.f32 %v248_v9, %v249_v15 }
  0x57   :  { %890 = vmatpush2.bf16.msra.mxu1 %v1092_v8  ;;  %850 = vmatprep.subr.bf16.mxu0 %v1093_v13  ;;  %v194_v52 = vmax.f32 %v192_v40, %v193_v44  ;;  %v378_v6 = vsel %vm367_vm4, %v354_v39, %v377_v63  ;;  %v234_v8 = vsel %vm72_vm0, %v1237_v60, -inf  ;;  %v262_v60 = vsel %vm72_vm0, %v1248_v2, -inf }
  0x58   :  { %891 = vmatprep.subr.bf16.mxu1 %v1095_v14  ;;  %v360_v10 = vunpack.c.l.b16 %v312_v62  ;;  %v379_v58 = vsel %vm369_vm5, %v356_v42, %v378_v6  ;;  %v222_v13 = vmax.f32 %v220_v48, %v221_v7  ;;  %v235_v14 = vrot.slane %v234_v8, 4 }
  0x59   :  { %v195_v11 = vrot.slane %v194_v52, 2  ;;  %v380_v59 = vsel %vm371_vm6, %v358_v45, %v379_v58  ;;  %v210_v23 = vmax.f32 %v208_v12, %v209_v18  ;;  %v263_v24 = vrot.slane %v262_v60, 4 }
  0x5a   :  { %851 = vmatpush2.bf16.msra.mxu0 %v1097_v27  ;;  %v381_v16 = vsel %vm373_vm7, %v360_v10, %v380_v59  ;;  %v223_v20 = vrot.slane %v222_v13, 2  ;;  %v236_v1 = vmax.f32 %v234_v8, %v235_v14  ;;  %v276_v25 = vsel %vm72_vm0, %v1252_v3, -inf }
  0x5b   :  { %892 = vmatpush2.bf16.msra.mxu1 %v1098_v28  ;;  %v196_v17 = vmax.f32 %v194_v52, %v195_v11  ;;  %v383_v19 = vpack.c.b16 %v381_v16, %v381_v16  ;;  %v251_v28 = vrot.slane %v250_v21, 2  ;;  %v277_v29 = vrot.slane %v276_v25, 4 }
  0x5c   :  { %v224_v26 = vmax.f32 %v222_v13, %v223_v20  ;;  %v237_v27 = vrot.slane %v236_v1, 2  ;;  %v211_v31 = vrot.slane %v210_v23, 1  ;;  %v264_v32 = vmax.f32 %v262_v60, %v263_v24 }
  0x5d   :  { %v197_v22 = vrot.slane %v196_v17, 1  ;;  %852 = vmatprep.mubr.bf16.mxu0 %v383_v19  ;;  %v290_v2 = vsel %vm72_vm0, %v1258_v5, -inf  ;;  %v252_v35 = vmax.f32 %v250_v21, %v251_v28  ;;  %v278_v36 = vmax.f32 %v276_v25, %v277_v29 }
  0x5e   :  { %v225_v33 = vrot.slane %v224_v26, 1  ;;  %v238_v34 = vmax.f32 %v236_v1, %v237_v27  ;;  %v212_v37 = vmax.f32 %v210_v23, %v211_v31  ;;  %v265_v38 = vrot.slane %v264_v32, 2 }
  0x5f   :  { %v198_v30 = vmax.f32 %v196_v17, %v197_v22  ;;  %v291_v39 = vrot.slane %v290_v2, 4  ;;  %v253_v42 = vrot.slane %v252_v35, 1  ;;  %v279_v43 = vrot.slane %v278_v36, 2 }
  0x60   :  { %v226_v3 = vmax.f32 %v224_v26, %v225_v33  ;;  %v239_v41 = vrot.slane %v238_v34, 1  ;;  %v266_v44 = vmax.f32 %v264_v32, %v265_v38  ;;  %v316_v46 = vpack.c.bf16 %v212_v37, %v212_v37 }
  0x61   :  { %v314_v40 = vpack.c.bf16 %v198_v30, %v198_v30  ;;  %v292_v45 = vmax.f32 %v290_v2, %v291_v39  ;;  %v254_v62 = vmax.f32 %v252_v35, %v253_v42  ;;  %v280_v63 = vmax.f32 %v278_v36, %v279_v43 }
  0x62   :  { %v240_v48 = vmax.f32 %v238_v34, %v239_v41  ;;  %v318_v5 = vpack.c.bf16 %v226_v3, %v226_v3  ;;  %v267_v52 = vrot.slane %v266_v44, 1  ;;  %v405_v6 = vunpack.c.l.b16 %v316_v46 }
  0x63   :  { %v403_v47 = vunpack.c.l.b16 %v314_v40  ;;  %v293_v4 = vrot.slane %v292_v45, 2  ;;  %v75_v7 = vadd.f32 %v74_v61, %v1216_v53  ;;  %v281_v8 = vrot.slane %v280_v63, 1 }
  0x64   :  { %v320_v9 = vpack.c.bf16 %v240_v48, %v240_v48  ;;  %v322_v10 = vpack.c.bf16 %v254_v62, %v254_v62  ;;  %v407_v58 = vunpack.c.l.b16 %v318_v5  ;;  %v268_v11 = vmax.f32 %v266_v44, %v267_v52 }
  0x65   :  { %v294_v12 = vmax.f32 %v292_v45, %v293_v4  ;;  %v425_v59 = vsel %vm361_vm1, %v405_v6, %v403_v47  ;;  %v76_v13 = vrot.slane %v75_v7, 2  ;;  %v282_v14 = vmax.f32 %v280_v63, %v281_v8 }
  0x66   :  { %v409_v15 = vunpack.c.l.b16 %v320_v9  ;;  %v411_v16 = vunpack.c.l.b16 %v322_v10  ;;  %v426_v17 = vsel %vm363_vm2, %v407_v58, %v425_v59  ;;  %v324_v60 = vpack.c.bf16 %v268_v11, %v268_v11 }
  0x67   :  { %v295_v18 = vrot.slane %v294_v12, 1  ;;  %v77_v19 = vadd.f32 %v76_v13, %v75_v7  ;;  %v87_v53 = vsel %vm72_vm0, %v1207_v49, 0.0  ;;  %v326_v61 = vpack.c.bf16 %v282_v14, %v282_v14 }
  0x68   :  { %v427_v20 = vsel %vm365_vm3, %v409_v15, %v426_v17  ;;  %v88_v1 = vrot.slane %v87_v53, 4  ;;  %v101_v21 = vsel %vm72_vm0, %v1209_v50, 0.0  ;;  %v413_v23 = vunpack.c.l.b16 %v324_v60 }
  0x69   :  { %v296_v22 = vmax.f32 %v294_v12, %v295_v18  ;;  %v428_v24 = vsel %vm367_vm4, %v411_v16, %v427_v20  ;;  %v78_v25 = vrot.slane %v77_v19, 1  ;;  %v415_v26 = vunpack.c.l.b16 %v326_v61 }
  0x6a   :  { %v89_v27 = vadd.f32 %v88_v1, %v87_v53  ;;  %v102_v28 = vrot.slane %v101_v21, 4  ;;  %v115_v29 = vsel %vm72_vm0, %v1211_v51, 0.0  ;;  %v429_v31 = vsel %vm369_vm5, %v413_v23, %v428_v24 }
  0x6b   :  { %v328_v30 = vpack.c.bf16 %v296_v22, %v296_v22  ;;  %v79_v32 = vadd.f32 %v78_v25, %v77_v19  ;;  %v116_v2 = vrot.slane %v115_v29, 4  ;;  %v430_v33 = vsel %vm371_vm6, %v415_v26, %v429_v31 }
  0x6c   :  { %v90_v34 = vrot.slane %v89_v27, 2  ;;  %v103_v35 = vadd.f32 %v102_v28, %v101_v21  ;;  %v129_v36 = vsel %vm72_vm0, %v1221_v55, 0.0  ;;  %v143_v40 = vsel %vm72_vm0, %v1223_v56, 0.0 }
  0x6d   :  { %v417_v37 = vunpack.c.l.b16 %v328_v30  ;;  %v117_v38 = vadd.f32 %v116_v2, %v115_v29  ;;  %v130_v39 = vrot.slane %v129_v36, 4  ;;  %v144_v42 = vrot.slane %v143_v40, 4 }
  0x6e   :  { %v91_v3 = vadd.f32 %v90_v34, %v89_v27  ;;  %v104_v41 = vrot.slane %v103_v35, 2  ;;  %v157_v43 = vsel %vm72_vm0, %v1225_v57, 0.0  ;;  %v171_v7 = vsel %vm72_vm0, %v1240_v0, 0.0 }
  0x6f   :  { %v431_v44 = vsel %vm373_vm7, %v417_v37, %v430_v33  ;;  %v118_v45 = vrot.slane %v117_v38, 2  ;;  %v131_v46 = vadd.f32 %v130_v39, %v129_v36  ;;  %v158_v47 = vrot.slane %v157_v43, 4 }
  0x70   :  { %v433_v48 = vpack.c.b16 %v431_v44, %v431_v44  ;;  %v92_v62 = vrot.slane %v91_v3, 1  ;;  %v105_v63 = vadd.f32 %v104_v41, %v103_v35  ;;  %v145_v5 = vadd.f32 %v144_v42, %v143_v40 }
  0x71   :  { %v119_v52 = vadd.f32 %v118_v45, %v117_v38  ;;  %v132_v4 = vrot.slane %v131_v46, 2  ;;  %v159_v6 = vadd.f32 %v158_v47, %v157_v43  ;;  %v172_v58 = vrot.slane %v171_v7, 4 }
  0x72   :  { %893 = vmatprep.mubr.bf16.mxu1 %v433_v48  ;;  %v93_v8 = vadd.f32 %v92_v62, %v91_v3  ;;  %v106_v9 = vrot.slane %v105_v63, 1  ;;  %v146_v10 = vrot.slane %v145_v5, 2  ;;  %v297_v13 = vpack.c.bf16 %v79_v32, %v79_v32 }
  0x73   :  { %v120_v11 = vrot.slane %v119_v52, 1  ;;  %v133_v12 = vadd.f32 %v132_v4, %v131_v46  ;;  %v160_v59 = vrot.slane %v159_v6, 2  ;;  %v173_v16 = vadd.f32 %v172_v58, %v171_v7 }
  0x74   :  { %v107_v14 = vadd.f32 %v106_v9, %v105_v63  ;;  %v147_v15 = vadd.f32 %v146_v10, %v145_v5  ;;  %v299_v17 = vpack.c.bf16 %v93_v8, %v93_v8  ;;  %v345_v53 = vunpack.c.l.b16 %v297_v13 }
  0x75   :  { %v121_v18 = vadd.f32 %v120_v11, %v119_v52  ;;  %v134_v60 = vrot.slane %v133_v12, 1  ;;  %v161_v19 = vadd.f32 %v160_v59, %v159_v6  ;;  %v174_v20 = vrot.slane %v173_v16, 2 }
  0x76   :  { %v148_v61 = vrot.slane %v147_v15, 1  ;;  %v301_v1 = vpack.c.bf16 %v107_v14, %v107_v14  ;;  %v347_v21 = vunpack.c.l.b16 %v299_v17  ;;  %v186_v25 = vrot.slane %v1219_v54, 4 }
  0x77   :  { %v135_v22 = vadd.f32 %v134_v60, %v133_v12  ;;  %v162_v23 = vrot.slane %v161_v19, 1  ;;  %v303_v24 = vpack.c.bf16 %v121_v18, %v121_v18  ;;  %v175_v27 = vadd.f32 %v174_v20, %v173_v16 }
  0x78   :  { %v149_v26 = vadd.f32 %v148_v61, %v147_v15  ;;  %v349_v28 = vunpack.c.l.b16 %v301_v1  ;;  %v362_v29 = vsel %vm361_vm1, %v347_v21, %v345_v53  ;;  %v187_v2 = vmax.f32 %v1219_v54, %v186_v25 }
  0x79   :  { %v163_v30 = vadd.f32 %v162_v23, %v161_v19  ;;  %v305_v31 = vpack.c.bf16 %v135_v22, %v135_v22  ;;  %v351_v32 = vunpack.c.l.b16 %v303_v24  ;;  %v176_v33 = vrot.slane %v175_v27, 1 }
  0x7a   :  { %v307_v34 = vpack.c.bf16 %v149_v26, %v149_v26  ;;  %v364_v35 = vsel %vm363_vm2, %v349_v28, %v362_v29  ;;  %v199_v36 = vsel %vm72_vm0, %v1207_v49, -inf  ;;  %v188_v40 = vrot.slane %v187_v2, 2 }
  0x7b   :  { %v309_v37 = vpack.c.bf16 %v163_v30, %v163_v30  ;;  %v353_v38 = vunpack.c.l.b16 %v305_v31  ;;  %v366_v39 = vsel %vm365_vm3, %v351_v32, %v364_v35  ;;  %v177_v3 = vadd.f32 %v176_v33, %v175_v27 }
  0x7c   :  { %v355_v41 = vunpack.c.l.b16 %v307_v34  ;;  %v200_v42 = vrot.slane %v199_v36, 4  ;;  %v213_v43 = vsel %vm72_vm0, %v1209_v50, -inf  ;;  %v189_v45 = vmax.f32 %v187_v2, %v188_v40 }
  0x7d   :  { %v357_v44 = vunpack.c.l.b16 %v309_v37  ;;  %v368_v54 = vsel %vm367_vm4, %v353_v38, %v366_v39  ;;  %v214_v46 = vrot.slane %v213_v43, 4  ;;  %v311_v47 = vpack.c.bf16 %v177_v3, %v177_v3 }
  0x7e   :  { %v370_v48 = vsel %vm369_vm5, %v355_v41, %v368_v54  ;;  %v201_v49 = vmax.f32 %v199_v36, %v200_v42  ;;  %v227_v62 = vsel %vm72_vm0, %v1211_v51, -inf  ;;  %v190_v5 = vrot.slane %v189_v45, 1 }
  0x7f   :  { %v372_v63 = vsel %vm371_vm6, %v357_v44, %v370_v48  ;;  %v215_v52 = vmax.f32 %v213_v43, %v214_v46  ;;  %v228_v4 = vrot.slane %v227_v62, 4  ;;  %v359_v6 = vunpack.c.l.b16 %v311_v47 }
  0x80   :  { %v202_v7 = vrot.slane %v201_v49, 2  ;;  %v241_v50 = vsel %vm72_vm0, %v1221_v55, -inf  ;;  %v255_v8 = vsel %vm72_vm0, %v1223_v56, -inf  ;;  %v191_v9 = vmax.f32 %v189_v45, %v190_v5 }
  0x81   :  { %v216_v10 = vrot.slane %v215_v52, 2  ;;  %v229_v58 = vmax.f32 %v227_v62, %v228_v4  ;;  %v242_v11 = vrot.slane %v241_v50, 4  ;;  %v374_v12 = vsel %vm373_vm7, %v359_v6, %v372_v63 }
  0x82   :  { %v203_v51 = vmax.f32 %v201_v49, %v202_v7  ;;  %v256_v59 = vrot.slane %v255_v8, 4  ;;  %v269_v13 = vsel %vm72_vm0, %v1225_v57, -inf  ;;  %v382_v14 = vpack.c.b16 %v374_v12, %v374_v12 }
  0x83   :  { %v217_v15 = vmax.f32 %v215_v52, %v216_v10  ;;  %v230_v16 = vrot.slane %v229_v58, 2  ;;  %v243_v17 = vmax.f32 %v241_v50, %v242_v11  ;;  %v270_v60 = vrot.slane %v269_v13, 4 }
  0x84   :  { %v204_v18 = vrot.slane %v203_v51, 1  ;;  %v257_v55 = vmax.f32 %v255_v8, %v256_v59  ;;  %v283_v56 = vsel %vm72_vm0, %v1240_v0, -inf  ;;  %853 = vmatmul.mubr.bf16.vlgmr.msra.gmra.mxu0 %v382_v14  ;;  %v313_v23 = vpack.c.bf16 %v191_v9, %v191_v9 }
  0x85   :  { %v218_v19 = vrot.slane %v217_v15, 1  ;;  %v231_v53 = vmax.f32 %v229_v58, %v230_v16  ;;  %v244_v61 = vrot.slane %v243_v17, 2  ;;  %v284_v20 = vrot.slane %v283_v56, 4 }
  0x86   :  { %v205_v1 = vmax.f32 %v203_v51, %v204_v18  ;;  %v258_v21 = vrot.slane %v257_v55, 2  ;;  %v271_v22 = vmax.f32 %v269_v13, %v270_v60  ;;  %v402_v30 = vunpack.c.l.b16 %v313_v23 }
  0x87   :  { %v219_v57 = vmax.f32 %v217_v15, %v218_v19  ;;  %v232_v24 = vrot.slane %v231_v53, 1  ;;  %v245_v25 = vmax.f32 %v243_v17, %v244_v61  ;;  %v285_v26 = vmax.f32 %v283_v56, %v284_v20 }
  0x88   :  { %v259_v27 = vmax.f32 %v257_v55, %v258_v21  ;;  %v272_v28 = vrot.slane %v271_v22, 2  ;;  %v315_v29 = vpack.c.bf16 %v205_v1, %v205_v1 }
  0x89   :  { %v233_v31 = vmax.f32 %v231_v53, %v232_v24  ;;  %v246_v32 = vrot.slane %v245_v25, 1  ;;  %v286_v0 = vrot.slane %v285_v26, 2  ;;  %v317_v2 = vpack.c.bf16 %v219_v57, %v219_v57 }
  0x8a   :  { %v260_v33 = vrot.slane %v259_v27, 1  ;;  %v273_v34 = vmax.f32 %v271_v22, %v272_v28  ;;  %v404_v35 = vunpack.c.l.b16 %v315_v29 }
  0x8b   :  { %v247_v36 = vmax.f32 %v245_v25, %v246_v32  ;;  %v287_v37 = vmax.f32 %v285_v26, %v286_v0  ;;  %v319_v38 = vpack.c.bf16 %v233_v31, %v233_v31  ;;  %v406_v39 = vunpack.c.l.b16 %v317_v2 }
  0x8c   :  { %v261_v40 = vmax.f32 %v259_v27, %v260_v33  ;;  %v274_v3 = vrot.slane %v273_v34, 1  ;;  %v418_v41 = vsel %vm361_vm1, %v404_v35, %v402_v30 }
  0x8d   :  { %v288_v42 = vrot.slane %v287_v37, 1  ;;  %v321_v43 = vpack.c.bf16 %v247_v36, %v247_v36  ;;  %v408_v44 = vunpack.c.l.b16 %v319_v38  ;;  %v419_v54 = vsel %vm363_vm2, %v406_v39, %v418_v41 }
  0x8e   :  { %v275_v45 = vmax.f32 %v273_v34, %v274_v3  ;;  %v323_v46 = vpack.c.bf16 %v261_v40, %v261_v40 }
  0x8f   :  { %v289_v47 = vmax.f32 %v287_v37, %v288_v42  ;;  %v410_v48 = vunpack.c.l.b16 %v321_v43  ;;  %v420_v49 = vsel %vm365_vm3, %v408_v44, %v419_v54 }
  0x90   :  { %v325_v62 = vpack.c.bf16 %v275_v45, %v275_v45  ;;  %v412_v63 = vunpack.c.l.b16 %v323_v46 }
  0x91   :  { %v327_v5 = vpack.c.bf16 %v289_v47, %v289_v47  ;;  %v421_v52 = vsel %vm367_vm4, %v410_v48, %v420_v49 }
  0x92   :  { %v414_v4 = vunpack.c.l.b16 %v325_v62  ;;  %v422_v6 = vsel %vm369_vm5, %v412_v63, %v421_v52 }
  0x93   :  { %v416_v7 = vunpack.c.l.b16 %v327_v5 }
  0x94   :  { %v423_v50 = vsel %vm371_vm6, %v414_v4, %v422_v6 }
  0x95   :  { %v424_v8 = vsel %vm373_vm7, %v416_v7, %v423_v50 }
  0x96   :  { %v432_v9 = vpack.c.b16 %v424_v8, %v424_v8 }
  0x98   :  { %894 = vmatmul.mubr.bf16.vlgmr.msra.gmra.mxu1 %v432_v9 }
 0x144   :  { %v854_v10 = vpop.f32.mrf.mxu0 }
 0x146   :  { %v856_v58 = vpop.f32.mrf.mxu0 }
 0x148   :  { %v858_v11 = vpop.f32.mrf.mxu0 }
 0x14a   :  { %v859_v12 = vpop.f32.mrf.mxu0 }
 0x158   :  { %v895_v51 = vpop.f32.mrf.mxu1 }
 0x159   :  { %v896_v59 = vadd.f32 %v895_v51, %v854_v10 }
 0x15a   :  { %v897_v13 = vpop.f32.mrf.mxu1 }
 0x15b   :  { %v996_v14 = vmul.f32 -1.442695, %v896_v59  ;;  %v898_v15 = vadd.f32 %v897_v13, %v856_v58 }
 0x15c   :  { %v899_v16 = vpop.f32.mrf.mxu1 }
 0x15d   :  { %1107 = vpow2.f32 %v996_v14  ;;  %v997_v17 = vmul.f32 -1.442695, %v898_v15 }
 0x15e   :  { %v900_v18 = vpop.f32.mrf.mxu1 }
 0x15f   :  { %1109 = vpow2.f32 %v997_v17 }
 0x16a   :  { %v1108_v55 = vpop.eup %1107 }
 0x16b   :  { %v908_v60 = vadd.f32 1.0, %v1108_v55 }
 0x16c   :  { %v1110_v56 = vpop.eup %1109 }
 0x16d   :  { %1111 = vrcp.f32 %v908_v60  ;;  %v909_v19 = vadd.f32 1.0, %v1110_v56 }
 0x16f   :  { %1113 = vrcp.f32 %v909_v19 }
 0x17a   :  { %v1112_v53 = vpop.eup %1111 }
 0x17b   :  { %914 = vst [vmem:[#allocation7] sm:$0xff] %v1112_v53 }
 0x17c   :  { %v1114_v61 = vpop.eup %1113 }
 0x17d   :  { %915 = vst [vmem:[#allocation7 + $0x8] sm:$0xff] %v1114_v61 }
 0x17e   :  { %1166 = shalt.err (!%p1163_p0)
}
 0x17f   :  { %925 = dma.vmem_to_hbm [thread:$0]  %s923_s1, 256, %s1356_s2, [#allocation4]  }
 0x180   :  { %1179 = dma.done.wait [#allocation4], 256  }
 0x181   :  { %1180 = vsyncadd [#allocation4], 4294967040 }
 0x182   :  { %929 = vsyncpa [#allocation3], 1 }
 0x183   :  { %930 = vsyncpa [#allocation6], 1 }
 0x184   :  { %931 = vsyncpa [#allocation4], 1 }

// kernel: tpu_custom_call.1
= control target key start
LH: loop header
LB: loop body
LE: loop exit
PB: predicated region body
PF: predicated region fallthrough
CT: control target
= control target key end

     0   :  { %7 = vsyncpa [#allocation3], 0  ;;  %s1354_s0 = inlined_call_operand.hbm [shape: f32[8,4,256], index: 0, kind: input, shape index: {}]   ;;  %s1355_s1 = inlined_call_operand.hbm [shape: bf16[512,256], index: 1, kind: input, shape index: {}]   ;;  %s1356_s2 = inlined_call_operand.hbm [shape: f32[8,256], index: 2, kind: output, shape index: {}]  }
   0x1   :  { %8 = vsyncpa [#allocation6], 0 }
   0x2   :  { %9 = vsyncpa [#allocation4], 0  ;;  %s1181_s9 = smov [#allocation2]  }
   0x3   :  { %s15_s10 = sshll.u32 %s1181_s9, 4  ;;  %s16_s10 = int_to_ptr.vmem [resolvable:$true] %s15_s10 }
   0x4   :  { %s1123_s11 = scalar_lea.vmem %s16_s10, 1024  ;;  %p1128_p1 = scmp.lt.s32.totalorder %s16_s10, %s16_s10 }
   0x5   :  { %p1124_p0 = scmp.ne.s32.totalorder %s16_s10, %s1123_s11  ;;  %p1129_p2 = scmp.lt.s32.totalorder %s1123_s11, %s1123_s11 }
   0x7   :  { %p1130_p3 = por %p1129_p2, %p1128_p1 }
   0x9   :  { %p1131_p4 = pnand %p1130_p3, %p1124_p0 }
   0xb   :  { %1134 = shalt.err (!%p1131_p4)
}
   0xc   :  { %s1182_s12 = smov 128   ;;  %s1183_s13 = smov 8  }
   0xd   :  { %21 = dma.hbm_to_vmem [thread:$0]  %s1354_s0, 1024, %s16_s10, [#allocation3], %s1182_s12, %s1182_s12, %s1183_s13  }
   0xe   :  { %s1184_s16 = smov [#allocation5]  }
   0xf   :  { %s27_s17 = sshll.u32 %s1184_s16, 4  ;;  %s28_s17 = int_to_ptr.vmem [resolvable:$true] %s27_s17 }
  0x10   :  { %s1143_s18 = scalar_lea.vmem %s28_s17, 8192  ;;  %p1148_p6 = scmp.lt.s32.totalorder %s28_s17, %s28_s17 }
  0x11   :  { %p1144_p5 = scmp.ne.s32.totalorder %s28_s17, %s1143_s18  ;;  %p1149_p7 = scmp.lt.s32.totalorder %s1143_s18, %s1143_s18 }
  0x13   :  { %p1150_p8 = por %p1149_p7, %p1148_p6 }
  0x15   :  { %p1151_p9 = pnand %p1150_p8, %p1144_p5 }
  0x17   :  { %1154 = shalt.err (!%p1151_p9)
}
  0x18   :  { %33 = dma.hbm_to_vmem [thread:$0]  %s1355_s1, 8192, %s28_s17, [#allocation6], %s1182_s12, %s1182_s12, %s1183_s13  }
  0x19   :  { %1175 = dma.done.wait [#allocation3], 1024  }
  0x1a   :  { %1176 = vsyncadd [#allocation3], 4294966272 }
  0x1b   :  { %1177 = dma.done.wait [#allocation6], 8192  }
  0x1c   :  { %1178 = vsyncadd [#allocation6], 4294959104  ;;  %v1003_v0 = vld [vmem:[#allocation5 + $0x74] ss:$8 sps:$4 sm:$0xff]   ;;  %v1007_v2 = vld [vmem:[#allocation5 + $0x70] ss:$8 sps:$4 sm:$0xff]  }
  0x1d   :  { %v1005_v1 = vld [vmem:[#allocation5 + $0x174] ss:$8 sps:$4 sm:$0xff]   ;;  %820 = vmatprep.subr.bf16.mxu0 %v1003_v0  ;;  %v1008_v3 = vld [vmem:[#allocation5 + $0x170] ss:$8 sps:$4 sm:$0xff]   ;;  %v1009_v4 = vld [vmem:[#allocation5 + $0x64] ss:$8 sps:$4 sm:$0xff]  }
  0x1e   :  { %861 = vmatprep.subr.bf16.mxu1 %v1005_v1  ;;  %821 = vmatpush1.bf16.msra.mxu0 %v1007_v2  ;;  %v1011_v5 = vld [vmem:[#allocation5 + $0x164] ss:$8 sps:$4 sm:$0xff]   ;;  %v1013_v6 = vld [vmem:[#allocation5 + $0x60] ss:$8 sps:$4 sm:$0xff]   ;;  %v1015_v8 = vld [vmem:[#allocation5 + $0x54] ss:$8 sps:$4 sm:$0xff]  }
  0x1f   :  { %862 = vmatpush1.bf16.msra.mxu1 %v1008_v3  ;;  %822 = vmatprep.subr.bf16.mxu0 %v1009_v4  ;;  %v1014_v7 = vld [vmem:[#allocation5 + $0x160] ss:$8 sps:$4 sm:$0xff]   ;;  %v1017_v9 = vld [vmem:[#allocation5 + $0x154] ss:$8 sps:$4 sm:$0xff]   ;;  %v1019_v10 = vld [vmem:[#allocation5 + $0x50] ss:$8 sps:$4 sm:$0xff]  }
  0x20   :  { %863 = vmatprep.subr.bf16.mxu1 %v1011_v5  ;;  %v1020_v11 = vld [vmem:[#allocation5 + $0x150] ss:$8 sps:$4 sm:$0xff]   ;;  %v1021_v12 = vld [vmem:[#allocation5 + $0x44] ss:$8 sps:$4 sm:$0xff]   ;;  %v1025_v14 = vld [vmem:[#allocation5 + $0x40] ss:$8 sps:$4 sm:$0xff]  }
  0x21   :  { %v1023_v13 = vld [vmem:[#allocation5 + $0x144] ss:$8 sps:$4 sm:$0xff]   ;;  %v1026_v15 = vld [vmem:[#allocation5 + $0x140] ss:$8 sps:$4 sm:$0xff]   ;;  %v1027_v16 = vld [vmem:[#allocation5 + $0x34] ss:$8 sps:$4 sm:$0xff]  }
  0x22   :  { %823 = vmatpush1.bf16.msra.mxu0 %v1013_v6  ;;  %v1029_v17 = vld [vmem:[#allocation5 + $0x134] ss:$8 sps:$4 sm:$0xff]   ;;  %v1031_v18 = vld [vmem:[#allocation5 + $0x30] ss:$8 sps:$4 sm:$0xff]   ;;  %v1033_v20 = vld [vmem:[#allocation5 + $0x24] ss:$8 sps:$4 sm:$0xff]  }
  0x23   :  { %864 = vmatpush1.bf16.msra.mxu1 %v1014_v7  ;;  %824 = vmatprep.subr.bf16.mxu0 %v1015_v8  ;;  %v1032_v19 = vld [vmem:[#allocation5 + $0x130] ss:$8 sps:$4 sm:$0xff]   ;;  %v1035_v21 = vld [vmem:[#allocation5 + $0x124] ss:$8 sps:$4 sm:$0xff]   ;;  %v1037_v22 = vld [vmem:[#allocation5 + $0x20] ss:$8 sps:$4 sm:$0xff]  }
  0x24   :  { %865 = vmatprep.subr.bf16.mxu1 %v1017_v9  ;;  %v1038_v23 = vld [vmem:[#allocation5 + $0x120] ss:$8 sps:$4 sm:$0xff]   ;;  %v1039_v24 = vld [vmem:[#allocation5 + $0x14] ss:$8 sps:$4 sm:$0xff]   ;;  %v1043_v26 = vld [vmem:[#allocation5 + $0x10] ss:$8 sps:$4 sm:$0xff]  }
  0x25   :  { %v1041_v25 = vld [vmem:[#allocation5 + $0x114] ss:$8 sps:$4 sm:$0xff]   ;;  %v1044_v27 = vld [vmem:[#allocation5 + $0x110] ss:$8 sps:$4 sm:$0xff]   ;;  %v1045_v28 = vld [vmem:[#allocation5 + $0x4] ss:$8 sps:$4 sm:$0xff]  }
  0x26   :  { %825 = vmatpush1.bf16.msra.mxu0 %v1019_v10  ;;  %v1047_v29 = vld [vmem:[#allocation5 + $0x104] ss:$8 sps:$4 sm:$0xff]   ;;  %v1049_v30 = vld [vmem:[#allocation5] ss:$8 sps:$4 sm:$0xff]   ;;  %v1051_v32 = vld [vmem:[#allocation5 + $0xf4] ss:$8 sps:$4 sm:$0xff]  }
  0x27   :  { %866 = vmatpush1.bf16.msra.mxu1 %v1020_v11  ;;  %826 = vmatprep.subr.bf16.mxu0 %v1021_v12  ;;  %v1050_v31 = vld [vmem:[#allocation5 + $0x100] ss:$8 sps:$4 sm:$0xff]   ;;  %v1053_v33 = vld [vmem:[#allocation5 + $0x1f4] ss:$8 sps:$4 sm:$0xff]   ;;  %v1055_v34 = vld [vmem:[#allocation5 + $0xf0] ss:$8 sps:$4 sm:$0xff]  }
  0x28   :  { %867 = vmatprep.subr.bf16.mxu1 %v1023_v13  ;;  %v1056_v35 = vld [vmem:[#allocation5 + $0x1f0] ss:$8 sps:$4 sm:$0xff]   ;;  %v1057_v36 = vld [vmem:[#allocation5 + $0xe4] ss:$8 sps:$4 sm:$0xff]   ;;  %v1061_v38 = vld [vmem:[#allocation5 + $0xe0] ss:$8 sps:$4 sm:$0xff]  }
  0x29   :  { %v1059_v37 = vld [vmem:[#allocation5 + $0x1e4] ss:$8 sps:$4 sm:$0xff]   ;;  %v1062_v39 = vld [vmem:[#allocation5 + $0x1e0] ss:$8 sps:$4 sm:$0xff]   ;;  %v1063_v40 = vld [vmem:[#allocation5 + $0xd4] ss:$8 sps:$4 sm:$0xff]  }
  0x2a   :  { %827 = vmatpush1.bf16.msra.mxu0 %v1025_v14  ;;  %v1065_v41 = vld [vmem:[#allocation5 + $0x1d4] ss:$8 sps:$4 sm:$0xff]   ;;  %v1067_v42 = vld [vmem:[#allocation5 + $0xd0] ss:$8 sps:$4 sm:$0xff]   ;;  %v1069_v44 = vld [vmem:[#allocation5 + $0xc4] ss:$8 sps:$4 sm:$0xff]  }
  0x2b   :  { %868 = vmatpush1.bf16.msra.mxu1 %v1026_v15  ;;  %828 = vmatprep.subr.bf16.mxu0 %v1027_v16  ;;  %v1068_v43 = vld [vmem:[#allocation5 + $0x1d0] ss:$8 sps:$4 sm:$0xff]   ;;  %vm72_vm0 = vcmask 1043456   ;;  %v1071_v45 = vld [vmem:[#allocation5 + $0x1c4] ss:$8 sps:$4 sm:$0xff]   ;;  %vm361_vm1 = vcmask 1041409  }
  0x2c   :  { %869 = vmatprep.subr.bf16.mxu1 %v1029_v17  ;;  %v1073_v46 = vld [vmem:[#allocation5 + $0xc0] ss:$8 sps:$4 sm:$0xff]   ;;  %v1209_v50 = vld [vmem:[#allocation2 + $0x10] sm:$0xff]  ;;  %v1211_v51 = vld [vmem:[#allocation2 + $0x18] sm:$0xff]  ;;  %vm363_vm2 = vcmask 1042434   ;;  %vm365_vm3 = vcmask 1043459  }
  0x2d   :  { %v1074_v47 = vld [vmem:[#allocation5 + $0x1c0] ss:$8 sps:$4 sm:$0xff]   ;;  %v1225_v57 = vld [vmem:[#allocation2 + $0x30] sm:$0xff]  ;;  %v1233_v59 = vcombine.high %v1209_v50, %v1209_v50  ;;  %v1237_v60 = vcombine.high %v1211_v51, %v1211_v51  ;;  %v1240_v0 = vld [vmem:[#allocation2 + $0x38] sm:$0xff]  ;;  %vm367_vm4 = vcmask 1044484   ;;  %vm369_vm5 = vcmask 1045509  }
  0x2e   :  { %829 = vmatpush1.bf16.msra.mxu0 %v1031_v18  ;;  %v40_v48 = vld [vmem:[#allocation2] sm:$0xff]  ;;  %v1207_v49 = vld [vmem:[#allocation2 + $0x8] sm:$0xff]  ;;  %v1075_v62 = vld [vmem:[#allocation5 + $0xb4] ss:$8 sps:$4 sm:$0xff]   ;;  %v1252_v3 = vcombine.high %v1225_v57, %v1225_v57  ;;  %v1258_v5 = vcombine.high %v1240_v0, %v1240_v0  ;;  %vm371_vm6 = vcmask 1046534   ;;  %vm373_vm7 = vcmask 1047559  }
  0x2f   :  { %870 = vmatpush1.bf16.msra.mxu1 %v1032_v19  ;;  %830 = vmatprep.subr.bf16.mxu0 %v1033_v20  ;;  %v1213_v52 = vcombine.high %v40_v48, %v40_v48  ;;  %v1216_v53 = vsel %vm72_vm0, %v40_v48, 0.0  ;;  %v1219_v54 = vsel %vm72_vm0, %v40_v48, -inf  ;;  %v1221_v55 = vld [vmem:[#allocation2 + $0x20] sm:$0xff]  ;;  %v1223_v56 = vld [vmem:[#allocation2 + $0x28] sm:$0xff]  ;;  %v1229_v58 = vcombine.high %v1207_v49, %v1207_v49  ;;  %v1077_v63 = vld [vmem:[#allocation5 + $0x1b4] ss:$8 sps:$4 sm:$0xff]  }
  0x30   :  { %871 = vmatprep.subr.bf16.mxu1 %v1035_v21  ;;  %v74_v61 = vrot.slane %v1216_v53, 4  ;;  %v1244_v1 = vcombine.high %v1221_v55, %v1221_v55  ;;  %v1248_v2 = vcombine.high %v1223_v56, %v1223_v56  ;;  %v108_v8 = vsel %vm72_vm0, %v1233_v59, 0.0  ;;  %v1079_v9 = vld [vmem:[#allocation5 + $0xb0] ss:$8 sps:$4 sm:$0xff]   ;;  %v1081_v19 = vld [vmem:[#allocation5 + $0xa4] ss:$8 sps:$4 sm:$0xff]  }
  0x31   :  { %v80_v4 = vsel %vm72_vm0, %v1213_v52, 0.0  ;;  %v94_v7 = vsel %vm72_vm0, %v1229_v58, 0.0  ;;  %v109_v11 = vrot.slane %v108_v8, 4  ;;  %v122_v12 = vsel %vm72_vm0, %v1237_v60, 0.0  ;;  %v1080_v14 = vld [vmem:[#allocation5 + $0x1b0] ss:$8 sps:$4 sm:$0xff]  }
  0x32   :  { %831 = vmatpush1.bf16.msra.mxu0 %v1037_v22  ;;  %v81_v6 = vrot.slane %v80_v4, 4  ;;  %v95_v10 = vrot.slane %v94_v7, 4  ;;  %v136_v13 = vsel %vm72_vm0, %v1244_v1, 0.0  ;;  %v123_v16 = vrot.slane %v122_v12, 4  ;;  %v1083_v20 = vld [vmem:[#allocation5 + $0x1a4] ss:$8 sps:$4 sm:$0xff]  }
  0x33   :  { %872 = vmatpush1.bf16.msra.mxu1 %v1038_v23  ;;  %832 = vmatprep.subr.bf16.mxu0 %v1039_v24  ;;  %v137_v17 = vrot.slane %v136_v13, 4  ;;  %v150_v18 = vsel %vm72_vm0, %v1248_v2, 0.0  ;;  %v110_v22 = vadd.f32 %v109_v11, %v108_v8  ;;  %v164_v24 = vsel %vm72_vm0, %v1252_v3, 0.0  ;;  %v1092_v8 = vld [vmem:[#allocation5 + $0x190] ss:$8 sps:$4 sm:$0xff]   ;;  %s1185_s0 = smov [#allocation7]  }
  0x34   :  { %873 = vmatprep.subr.bf16.mxu1 %v1041_v25  ;;  %v82_v15 = vadd.f32 %v81_v6, %v80_v4  ;;  %v96_v21 = vadd.f32 %v95_v10, %v94_v7  ;;  %v151_v23 = vrot.slane %v150_v18, 4  ;;  %v1091_v7 = vld [vmem:[#allocation5 + $0x90] ss:$8 sps:$4 sm:$0xff]   ;;  %s922_s1 = sshll.u32 %s1185_s0, 4  ;;  %s923_s1 = int_to_ptr.vmem [resolvable:$true] %s922_s1 }
  0x35   :  { %s1155_s21 = scalar_lea.vmem %s923_s1, 256  ;;  %p1160_p11 = scmp.lt.s32.totalorder %s923_s1, %s923_s1 }
  0x36   :  { %833 = vmatpush1.bf16.msra.mxu0 %v1043_v26  ;;  %v83_v25 = vrot.slane %v82_v15, 2  ;;  %v124_v26 = vadd.f32 %v123_v16, %v122_v12  ;;  %p1156_p10 = scmp.ne.s32.totalorder %s923_s1, %s1155_s21  ;;  %p1161_p12 = scmp.lt.s32.totalorder %s1155_s21, %s1155_s21 }
  0x37   :  { %874 = vmatpush1.bf16.msra.mxu1 %v1044_v27  ;;  %834 = vmatprep.subr.bf16.mxu0 %v1045_v28  ;;  %v138_v27 = vadd.f32 %v137_v17, %v136_v13  ;;  %v165_v28 = vrot.slane %v164_v24, 4  ;;  %v1093_v13 = vld [vmem:[#allocation5 + $0x84] ss:$8 sps:$4 sm:$0xff]  }
  0x38   :  { %875 = vmatprep.subr.bf16.mxu1 %v1047_v29  ;;  %v97_v29 = vrot.slane %v96_v21, 2  ;;  %p1162_p13 = por %p1161_p12, %p1160_p11 }
  0x3a   :  { %835 = vmatpush1.bf16.msra.mxu0 %v1049_v30  ;;  %v111_v30 = vrot.slane %v110_v22, 2  ;;  %p1163_p0 = pnand %p1162_p13, %p1156_p10 }
  0x3b   :  { %876 = vmatpush1.bf16.msra.mxu1 %v1050_v31  ;;  %836 = vmatprep.subr.bf16.mxu0 %v1051_v32  ;;  %v152_v31 = vadd.f32 %v151_v23, %v150_v18  ;;  %v178_v32 = vsel %vm72_vm0, %v1258_v5, 0.0 }
  0x3c   :  { %877 = vmatprep.subr.bf16.mxu1 %v1053_v33  ;;  %v1085_v33 = vld [vmem:[#allocation5 + $0xa0] ss:$8 sps:$4 sm:$0xff]  }
  0x3e   :  { %837 = vmatpush2.bf16.msra.mxu0 %v1055_v34  ;;  %v1086_v34 = vld [vmem:[#allocation5 + $0x1a0] ss:$8 sps:$4 sm:$0xff]  }
  0x3f   :  { %878 = vmatpush2.bf16.msra.mxu1 %v1056_v35  ;;  %838 = vmatprep.subr.bf16.mxu0 %v1057_v36  ;;  %v84_v35 = vadd.f32 %v83_v25, %v82_v15  ;;  %v125_v36 = vrot.slane %v124_v26, 2 }
  0x40   :  { %879 = vmatprep.subr.bf16.mxu1 %v1059_v37  ;;  %v139_v37 = vrot.slane %v138_v27, 2 }
  0x42   :  { %839 = vmatpush2.bf16.msra.mxu0 %v1061_v38  ;;  %v166_v38 = vadd.f32 %v165_v28, %v164_v24  ;;  %v1098_v28 = vld [vmem:[#allocation5 + $0x180] ss:$8 sps:$4 sm:$0xff]  }
  0x43   :  { %880 = vmatpush2.bf16.msra.mxu1 %v1062_v39  ;;  %840 = vmatprep.subr.bf16.mxu0 %v1063_v40  ;;  %v1087_v39 = vld [vmem:[#allocation5 + $0x94] ss:$8 sps:$4 sm:$0xff]  }
  0x44   :  { %881 = vmatprep.subr.bf16.mxu1 %v1065_v41  ;;  %v1089_v40 = vld [vmem:[#allocation5 + $0x194] ss:$8 sps:$4 sm:$0xff]   ;;  %v98_v41 = vadd.f32 %v97_v29, %v96_v21  ;;  %v167_v48 = vrot.slane %v166_v38, 2 }
  0x46   :  { %841 = vmatpush2.bf16.msra.mxu0 %v1067_v42  ;;  %v112_v42 = vadd.f32 %v111_v30, %v110_v22  ;;  %v168_v12 = vadd.f32 %v167_v48, %v166_v38  ;;  %v220_v48 = vsel %vm72_vm0, %v1233_v59, -inf }
  0x47   :  { %882 = vmatpush2.bf16.msra.mxu1 %v1068_v43  ;;  %842 = vmatprep.subr.bf16.mxu0 %v1069_v44  ;;  %v153_v43 = vrot.slane %v152_v31, 2  ;;  %v179_v44 = vrot.slane %v178_v32, 4 }
  0x48   :  { %883 = vmatprep.subr.bf16.mxu1 %v1071_v45  ;;  %v85_v45 = vrot.slane %v84_v35, 1  ;;  %v169_v21 = vrot.slane %v168_v12, 1 }
  0x49   :  { %v154_v4 = vadd.f32 %v153_v43, %v152_v31  ;;  %v180_v6 = vadd.f32 %v179_v44, %v178_v32 }
  0x4a   :  { %843 = vmatpush2.bf16.msra.mxu0 %v1073_v46  ;;  %v126_v46 = vadd.f32 %v125_v36, %v124_v26  ;;  %v170_v29 = vadd.f32 %v169_v21, %v168_v12 }
  0x4b   :  { %884 = vmatpush2.bf16.msra.mxu1 %v1074_v47  ;;  %844 = vmatprep.subr.bf16.mxu0 %v1075_v62  ;;  %v140_v47 = vadd.f32 %v139_v37, %v138_v27  ;;  %v99_v62 = vrot.slane %v98_v41, 1  ;;  %v155_v17 = vrot.slane %v154_v4, 1  ;;  %v181_v18 = vrot.slane %v180_v6, 2  ;;  %v1097_v27 = vld [vmem:[#allocation5 + $0x80] ss:$8 sps:$4 sm:$0xff]  }
  0x4c   :  { %885 = vmatprep.subr.bf16.mxu1 %v1077_v63  ;;  %v113_v63 = vrot.slane %v112_v42, 1  ;;  %v127_v10 = vrot.slane %v126_v46, 1  ;;  %v310_v37 = vpack.c.bf16 %v170_v29, %v170_v29 }
  0x4d   :  { %v141_v11 = vrot.slane %v140_v47, 1  ;;  %v100_v15 = vadd.f32 %v99_v62, %v98_v41  ;;  %v156_v23 = vadd.f32 %v155_v17, %v154_v4  ;;  %v182_v24 = vadd.f32 %v181_v18, %v180_v6 }
  0x4e   :  { %845 = vmatpush2.bf16.msra.mxu0 %v1079_v9  ;;  %v86_v9 = vadd.f32 %v85_v45, %v84_v35  ;;  %v114_v16 = vadd.f32 %v113_v63, %v112_v42  ;;  %v358_v45 = vunpack.c.l.b16 %v310_v37 }
  0x4f   :  { %886 = vmatpush2.bf16.msra.mxu1 %v1080_v14  ;;  %846 = vmatprep.subr.bf16.mxu0 %v1081_v19  ;;  %v1095_v14 = vld [vmem:[#allocation5 + $0x184] ss:$8 sps:$4 sm:$0xff]   ;;  %v128_v19 = vadd.f32 %v127_v10, %v126_v46  ;;  %v300_v25 = vpack.c.bf16 %v100_v15, %v100_v15 }
  0x50   :  { %887 = vmatprep.subr.bf16.mxu1 %v1083_v20  ;;  %v142_v20 = vadd.f32 %v141_v11, %v140_v47  ;;  %v298_v22 = vpack.c.bf16 %v86_v9, %v86_v9  ;;  %v302_v26 = vpack.c.bf16 %v114_v16, %v114_v16  ;;  %v206_v47 = vsel %vm72_vm0, %v1229_v58, -inf }
  0x51   :  { %v304_v30 = vpack.c.bf16 %v128_v19, %v128_v19  ;;  %v348_v35 = vunpack.c.l.b16 %v300_v25  ;;  %v207_v4 = vrot.slane %v206_v47, 4  ;;  %v248_v9 = vsel %vm72_vm0, %v1244_v1, -inf }
  0x52   :  { %847 = vmatpush2.bf16.msra.mxu0 %v1085_v33  ;;  %v306_v31 = vpack.c.bf16 %v142_v20, %v142_v20  ;;  %v346_v32 = vunpack.c.l.b16 %v298_v22  ;;  %v183_v33 = vrot.slane %v182_v24, 1  ;;  %v350_v36 = vunpack.c.l.b16 %v302_v26 }
  0x53   :  { %888 = vmatpush2.bf16.msra.mxu1 %v1086_v34  ;;  %848 = vmatprep.subr.bf16.mxu0 %v1087_v39  ;;  %v308_v34 = vpack.c.bf16 %v156_v23, %v156_v23  ;;  %v352_v38 = vunpack.c.l.b16 %v304_v30  ;;  %v208_v12 = vmax.f32 %v206_v47, %v207_v4  ;;  %v249_v15 = vrot.slane %v248_v9, 4 }
  0x54   :  { %889 = vmatprep.subr.bf16.mxu1 %v1089_v40  ;;  %v354_v39 = vunpack.c.l.b16 %v306_v31  ;;  %v192_v40 = vsel %vm72_vm0, %v1213_v52, -inf  ;;  %v184_v41 = vadd.f32 %v183_v33, %v182_v24  ;;  %v375_v43 = vsel %vm361_vm1, %v348_v35, %v346_v32 }
  0x55   :  { %v356_v42 = vunpack.c.l.b16 %v308_v34  ;;  %v193_v44 = vrot.slane %v192_v40, 4  ;;  %v376_v46 = vsel %vm363_vm2, %v350_v36, %v375_v43  ;;  %v209_v18 = vrot.slane %v208_v12, 2 }
  0x56   :  { %849 = vmatpush2.bf16.msra.mxu0 %v1091_v7  ;;  %v312_v62 = vpack.c.bf16 %v184_v41, %v184_v41  ;;  %v377_v63 = vsel %vm365_vm3, %v352_v38, %v376_v46  ;;  %v221_v7 = vrot.slane %v220_v48, 4  ;;  %v250_v21 = vmax.f32 %v248_v9, %v249_v15 }
  0x57   :  { %890 = vmatpush2.bf16.msra.mxu1 %v1092_v8  ;;  %850 = vmatprep.subr.bf16.mxu0 %v1093_v13  ;;  %v194_v52 = vmax.f32 %v192_v40, %v193_v44  ;;  %v378_v6 = vsel %vm367_vm4, %v354_v39, %v377_v63  ;;  %v234_v8 = vsel %vm72_vm0, %v1237_v60, -inf  ;;  %v262_v60 = vsel %vm72_vm0, %v1248_v2, -inf }
  0x58   :  { %891 = vmatprep.subr.bf16.mxu1 %v1095_v14  ;;  %v360_v10 = vunpack.c.l.b16 %v312_v62  ;;  %v379_v58 = vsel %vm369_vm5, %v356_v42, %v378_v6  ;;  %v222_v13 = vmax.f32 %v220_v48, %v221_v7  ;;  %v235_v14 = vrot.slane %v234_v8, 4 }
  0x59   :  { %v195_v11 = vrot.slane %v194_v52, 2  ;;  %v380_v59 = vsel %vm371_vm6, %v358_v45, %v379_v58  ;;  %v210_v23 = vmax.f32 %v208_v12, %v209_v18  ;;  %v263_v24 = vrot.slane %v262_v60, 4 }
  0x5a   :  { %851 = vmatpush2.bf16.msra.mxu0 %v1097_v27  ;;  %v381_v16 = vsel %vm373_vm7, %v360_v10, %v380_v59  ;;  %v223_v20 = vrot.slane %v222_v13, 2  ;;  %v236_v1 = vmax.f32 %v234_v8, %v235_v14  ;;  %v276_v25 = vsel %vm72_vm0, %v1252_v3, -inf }
  0x5b   :  { %892 = vmatpush2.bf16.msra.mxu1 %v1098_v28  ;;  %v196_v17 = vmax.f32 %v194_v52, %v195_v11  ;;  %v383_v19 = vpack.c.b16 %v381_v16, %v381_v16  ;;  %v251_v28 = vrot.slane %v250_v21, 2  ;;  %v277_v29 = vrot.slane %v276_v25, 4 }
  0x5c   :  { %v224_v26 = vmax.f32 %v222_v13, %v223_v20  ;;  %v237_v27 = vrot.slane %v236_v1, 2  ;;  %v211_v31 = vrot.slane %v210_v23, 1  ;;  %v264_v32 = vmax.f32 %v262_v60, %v263_v24 }
  0x5d   :  { %v197_v22 = vrot.slane %v196_v17, 1  ;;  %852 = vmatprep.mubr.bf16.mxu0 %v383_v19  ;;  %v290_v2 = vsel %vm72_vm0, %v1258_v5, -inf  ;;  %v252_v35 = vmax.f32 %v250_v21, %v251_v28  ;;  %v278_v36 = vmax.f32 %v276_v25, %v277_v29 }
  0x5e   :  { %v225_v33 = vrot.slane %v224_v26, 1  ;;  %v238_v34 = vmax.f32 %v236_v1, %v237_v27  ;;  %v212_v37 = vmax.f32 %v210_v23, %v211_v31  ;;  %v265_v38 = vrot.slane %v264_v32, 2 }
  0x5f   :  { %v198_v30 = vmax.f32 %v196_v17, %v197_v22  ;;  %v291_v39 = vrot.slane %v290_v2, 4  ;;  %v253_v42 = vrot.slane %v252_v35, 1  ;;  %v279_v43 = vrot.slane %v278_v36, 2 }
  0x60   :  { %v226_v3 = vmax.f32 %v224_v26, %v225_v33  ;;  %v239_v41 = vrot.slane %v238_v34, 1  ;;  %v266_v44 = vmax.f32 %v264_v32, %v265_v38  ;;  %v316_v46 = vpack.c.bf16 %v212_v37, %v212_v37 }
  0x61   :  { %v314_v40 = vpack.c.bf16 %v198_v30, %v198_v30  ;;  %v292_v45 = vmax.f32 %v290_v2, %v291_v39  ;;  %v254_v62 = vmax.f32 %v252_v35, %v253_v42  ;;  %v280_v63 = vmax.f32 %v278_v36, %v279_v43 }
  0x62   :  { %v240_v48 = vmax.f32 %v238_v34, %v239_v41  ;;  %v318_v5 = vpack.c.bf16 %v226_v3, %v226_v3  ;;  %v267_v52 = vrot.slane %v266_v44, 1  ;;  %v405_v6 = vunpack.c.l.b16 %v316_v46 }
  0x63   :  { %v403_v47 = vunpack.c.l.b16 %v314_v40  ;;  %v293_v4 = vrot.slane %v292_v45, 2  ;;  %v75_v7 = vadd.f32 %v74_v61, %v1216_v53  ;;  %v281_v8 = vrot.slane %v280_v63, 1 }
  0x64   :  { %v320_v9 = vpack.c.bf16 %v240_v48, %v240_v48  ;;  %v322_v10 = vpack.c.bf16 %v254_v62, %v254_v62  ;;  %v407_v58 = vunpack.c.l.b16 %v318_v5  ;;  %v268_v11 = vmax.f32 %v266_v44, %v267_v52 }
  0x65   :  { %v294_v12 = vmax.f32 %v292_v45, %v293_v4  ;;  %v425_v59 = vsel %vm361_vm1, %v405_v6, %v403_v47  ;;  %v76_v13 = vrot.slane %v75_v7, 2  ;;  %v282_v14 = vmax.f32 %v280_v63, %v281_v8 }
  0x66   :  { %v409_v15 = vunpack.c.l.b16 %v320_v9  ;;  %v411_v16 = vunpack.c.l.b16 %v322_v10  ;;  %v426_v17 = vsel %vm363_vm2, %v407_v58, %v425_v59  ;;  %v324_v60 = vpack.c.bf16 %v268_v11, %v268_v11 }
  0x67   :  { %v295_v18 = vrot.slane %v294_v12, 1  ;;  %v77_v19 = vadd.f32 %v76_v13, %v75_v7  ;;  %v87_v53 = vsel %vm72_vm0, %v1207_v49, 0.0  ;;  %v326_v61 = vpack.c.bf16 %v282_v14, %v282_v14 }
  0x68   :  { %v427_v20 = vsel %vm365_vm3, %v409_v15, %v426_v17  ;;  %v88_v1 = vrot.slane %v87_v53, 4  ;;  %v101_v21 = vsel %vm72_vm0, %v1209_v50, 0.0  ;;  %v413_v23 = vunpack.c.l.b16 %v324_v60 }
  0x69   :  { %v296_v22 = vmax.f32 %v294_v12, %v295_v18  ;;  %v428_v24 = vsel %vm367_vm4, %v411_v16, %v427_v20  ;;  %v78_v25 = vrot.slane %v77_v19, 1  ;;  %v415_v26 = vunpack.c.l.b16 %v326_v61 }
  0x6a   :  { %v89_v27 = vadd.f32 %v88_v1, %v87_v53  ;;  %v102_v28 = vrot.slane %v101_v21, 4  ;;  %v115_v29 = vsel %vm72_vm0, %v1211_v51, 0.0  ;;  %v429_v31 = vsel %vm369_vm5, %v413_v23, %v428_v24 }
  0x6b   :  { %v328_v30 = vpack.c.bf16 %v296_v22, %v296_v22  ;;  %v79_v32 = vadd.f32 %v78_v25, %v77_v19  ;;  %v116_v2 = vrot.slane %v115_v29, 4  ;;  %v430_v33 = vsel %vm371_vm6, %v415_v26, %v429_v31 }
  0x6c   :  { %v90_v34 = vrot.slane %v89_v27, 2  ;;  %v103_v35 = vadd.f32 %v102_v28, %v101_v21  ;;  %v129_v36 = vsel %vm72_vm0, %v1221_v55, 0.0  ;;  %v143_v40 = vsel %vm72_vm0, %v1223_v56, 0.0 }
  0x6d   :  { %v417_v37 = vunpack.c.l.b16 %v328_v30  ;;  %v117_v38 = vadd.f32 %v116_v2, %v115_v29  ;;  %v130_v39 = vrot.slane %v129_v36, 4  ;;  %v144_v42 = vrot.slane %v143_v40, 4 }
  0x6e   :  { %v91_v3 = vadd.f32 %v90_v34, %v89_v27  ;;  %v104_v41 = vrot.slane %v103_v35, 2  ;;  %v157_v43 = vsel %vm72_vm0, %v1225_v57, 0.0  ;;  %v171_v7 = vsel %vm72_vm0, %v1240_v0, 0.0 }
  0x6f   :  { %v431_v44 = vsel %vm373_vm7, %v417_v37, %v430_v33  ;;  %v118_v45 = vrot.slane %v117_v38, 2  ;;  %v131_v46 = vadd.f32 %v130_v39, %v129_v36  ;;  %v158_v47 = vrot.slane %v157_v43, 4 }
  0x70   :  { %v433_v48 = vpack.c.b16 %v431_v44, %v431_v44  ;;  %v92_v62 = vrot.slane %v91_v3, 1  ;;  %v105_v63 = vadd.f32 %v104_v41, %v103_v35  ;;  %v145_v5 = vadd.f32 %v144_v42, %v143_v40 }
  0x71   :  { %v119_v52 = vadd.f32 %v118_v45, %v117_v38  ;;  %v132_v4 = vrot.slane %v131_v46, 2  ;;  %v159_v6 = vadd.f32 %v158_v47, %v157_v43  ;;  %v172_v58 = vrot.slane %v171_v7, 4 }
  0x72   :  { %893 = vmatprep.mubr.bf16.mxu1 %v433_v48  ;;  %v93_v8 = vadd.f32 %v92_v62, %v91_v3  ;;  %v106_v9 = vrot.slane %v105_v63, 1  ;;  %v146_v10 = vrot.slane %v145_v5, 2  ;;  %v297_v13 = vpack.c.bf16 %v79_v32, %v79_v32 }
  0x73   :  { %v120_v11 = vrot.slane %v119_v52, 1  ;;  %v133_v12 = vadd.f32 %v132_v4, %v131_v46  ;;  %v160_v59 = vrot.slane %v159_v6, 2  ;;  %v173_v16 = vadd.f32 %v172_v58, %v171_v7 }
  0x74   :  { %v107_v14 = vadd.f32 %v106_v9, %v105_v63  ;;  %v147_v15 = vadd.f32 %v146_v10, %v145_v5  ;;  %v299_v17 = vpack.c.bf16 %v93_v8, %v93_v8  ;;  %v345_v53 = vunpack.c.l.b16 %v297_v13 }
  0x75   :  { %v121_v18 = vadd.f32 %v120_v11, %v119_v52  ;;  %v134_v60 = vrot.slane %v133_v12, 1  ;;  %v161_v19 = vadd.f32 %v160_v59, %v159_v6  ;;  %v174_v20 = vrot.slane %v173_v16, 2 }
  0x76   :  { %v148_v61 = vrot.slane %v147_v15, 1  ;;  %v301_v1 = vpack.c.bf16 %v107_v14, %v107_v14  ;;  %v347_v21 = vunpack.c.l.b16 %v299_v17  ;;  %v186_v25 = vrot.slane %v1219_v54, 4 }
  0x77   :  { %v135_v22 = vadd.f32 %v134_v60, %v133_v12  ;;  %v162_v23 = vrot.slane %v161_v19, 1  ;;  %v303_v24 = vpack.c.bf16 %v121_v18, %v121_v18  ;;  %v175_v27 = vadd.f32 %v174_v20, %v173_v16 }
  0x78   :  { %v149_v26 = vadd.f32 %v148_v61, %v147_v15  ;;  %v349_v28 = vunpack.c.l.b16 %v301_v1  ;;  %v362_v29 = vsel %vm361_vm1, %v347_v21, %v345_v53  ;;  %v187_v2 = vmax.f32 %v1219_v54, %v186_v25 }
  0x79   :  { %v163_v30 = vadd.f32 %v162_v23, %v161_v19  ;;  %v305_v31 = vpack.c.bf16 %v135_v22, %v135_v22  ;;  %v351_v32 = vunpack.c.l.b16 %v303_v24  ;;  %v176_v33 = vrot.slane %v175_v27, 1 }
  0x7a   :  { %v307_v34 = vpack.c.bf16 %v149_v26, %v149_v26  ;;  %v364_v35 = vsel %vm363_vm2, %v349_v28, %v362_v29  ;;  %v199_v36 = vsel %vm72_vm0, %v1207_v49, -inf  ;;  %v188_v40 = vrot.slane %v187_v2, 2 }
  0x7b   :  { %v309_v37 = vpack.c.bf16 %v163_v30, %v163_v30  ;;  %v353_v38 = vunpack.c.l.b16 %v305_v31  ;;  %v366_v39 = vsel %vm365_vm3, %v351_v32, %v364_v35  ;;  %v177_v3 = vadd.f32 %v176_v33, %v175_v27 }
  0x7c   :  { %v355_v41 = vunpack.c.l.b16 %v307_v34  ;;  %v200_v42 = vrot.slane %v199_v36, 4  ;;  %v213_v43 = vsel %vm72_vm0, %v1209_v50, -inf  ;;  %v189_v45 = vmax.f32 %v187_v2, %v188_v40 }
  0x7d   :  { %v357_v44 = vunpack.c.l.b16 %v309_v37  ;;  %v368_v54 = vsel %vm367_vm4, %v353_v38, %v366_v39  ;;  %v214_v46 = vrot.slane %v213_v43, 4  ;;  %v311_v47 = vpack.c.bf16 %v177_v3, %v177_v3 }
  0x7e   :  { %v370_v48 = vsel %vm369_vm5, %v355_v41, %v368_v54  ;;  %v201_v49 = vmax.f32 %v199_v36, %v200_v42  ;;  %v227_v62 = vsel %vm72_vm0, %v1211_v51, -inf  ;;  %v190_v5 = vrot.slane %v189_v45, 1 }
  0x7f   :  { %v372_v63 = vsel %vm371_vm6, %v357_v44, %v370_v48  ;;  %v215_v52 = vmax.f32 %v213_v43, %v214_v46  ;;  %v228_v4 = vrot.slane %v227_v62, 4  ;;  %v359_v6 = vunpack.c.l.b16 %v311_v47 }
  0x80   :  { %v202_v7 = vrot.slane %v201_v49, 2  ;;  %v241_v50 = vsel %vm72_vm0, %v1221_v55, -inf  ;;  %v255_v8 = vsel %vm72_vm0, %v1223_v56, -inf  ;;  %v191_v9 = vmax.f32 %v189_v45, %v190_v5 }
  0x81   :  { %v216_v10 = vrot.slane %v215_v52, 2  ;;  %v229_v58 = vmax.f32 %v227_v62, %v228_v4  ;;  %v242_v11 = vrot.slane %v241_v50, 4  ;;  %v374_v12 = vsel %vm373_vm7, %v359_v6, %v372_v63 }
  0x82   :  { %v203_v51 = vmax.f32 %v201_v49, %v202_v7  ;;  %v256_v59 = vrot.slane %v255_v8, 4  ;;  %v269_v13 = vsel %vm72_vm0, %v1225_v57, -inf  ;;  %v382_v14 = vpack.c.b16 %v374_v12, %v374_v12 }
  0x83   :  { %v217_v15 = vmax.f32 %v215_v52, %v216_v10  ;;  %v230_v16 = vrot.slane %v229_v58, 2  ;;  %v243_v17 = vmax.f32 %v241_v50, %v242_v11  ;;  %v270_v60 = vrot.slane %v269_v13, 4 }
  0x84   :  { %v204_v18 = vrot.slane %v203_v51, 1  ;;  %v257_v55 = vmax.f32 %v255_v8, %v256_v59  ;;  %v283_v56 = vsel %vm72_vm0, %v1240_v0, -inf  ;;  %853 = vmatmul.mubr.bf16.vlgmr.msra.gmra.mxu0 %v382_v14  ;;  %v313_v23 = vpack.c.bf16 %v191_v9, %v191_v9 }
  0x85   :  { %v218_v19 = vrot.slane %v217_v15, 1  ;;  %v231_v53 = vmax.f32 %v229_v58, %v230_v16  ;;  %v244_v61 = vrot.slane %v243_v17, 2  ;;  %v284_v20 = vrot.slane %v283_v56, 4 }
  0x86   :  { %v205_v1 = vmax.f32 %v203_v51, %v204_v18  ;;  %v258_v21 = vrot.slane %v257_v55, 2  ;;  %v271_v22 = vmax.f32 %v269_v13, %v270_v60  ;;  %v402_v30 = vunpack.c.l.b16 %v313_v23 }
  0x87   :  { %v219_v57 = vmax.f32 %v217_v15, %v218_v19  ;;  %v232_v24 = vrot.slane %v231_v53, 1  ;;  %v245_v25 = vmax.f32 %v243_v17, %v244_v61  ;;  %v285_v26 = vmax.f32 %v283_v56, %v284_v20 }
  0x88   :  { %v259_v27 = vmax.f32 %v257_v55, %v258_v21  ;;  %v272_v28 = vrot.slane %v271_v22, 2  ;;  %v315_v29 = vpack.c.bf16 %v205_v1, %v205_v1 }
  0x89   :  { %v233_v31 = vmax.f32 %v231_v53, %v232_v24  ;;  %v246_v32 = vrot.slane %v245_v25, 1  ;;  %v286_v0 = vrot.slane %v285_v26, 2  ;;  %v317_v2 = vpack.c.bf16 %v219_v57, %v219_v57 }
  0x8a   :  { %v260_v33 = vrot.slane %v259_v27, 1  ;;  %v273_v34 = vmax.f32 %v271_v22, %v272_v28  ;;  %v404_v35 = vunpack.c.l.b16 %v315_v29 }
  0x8b   :  { %v247_v36 = vmax.f32 %v245_v25, %v246_v32  ;;  %v287_v37 = vmax.f32 %v285_v26, %v286_v0  ;;  %v319_v38 = vpack.c.bf16 %v233_v31, %v233_v31  ;;  %v406_v39 = vunpack.c.l.b16 %v317_v2 }
  0x8c   :  { %v261_v40 = vmax.f32 %v259_v27, %v260_v33  ;;  %v274_v3 = vrot.slane %v273_v34, 1  ;;  %v418_v41 = vsel %vm361_vm1, %v404_v35, %v402_v30 }
  0x8d   :  { %v288_v42 = vrot.slane %v287_v37, 1  ;;  %v321_v43 = vpack.c.bf16 %v247_v36, %v247_v36  ;;  %v408_v44 = vunpack.c.l.b16 %v319_v38  ;;  %v419_v54 = vsel %vm363_vm2, %v406_v39, %v418_v41 }
  0x8e   :  { %v275_v45 = vmax.f32 %v273_v34, %v274_v3  ;;  %v323_v46 = vpack.c.bf16 %v261_v40, %v261_v40 }
  0x8f   :  { %v289_v47 = vmax.f32 %v287_v37, %v288_v42  ;;  %v410_v48 = vunpack.c.l.b16 %v321_v43  ;;  %v420_v49 = vsel %vm365_vm3, %v408_v44, %v419_v54 }
  0x90   :  { %v325_v62 = vpack.c.bf16 %v275_v45, %v275_v45  ;;  %v412_v63 = vunpack.c.l.b16 %v323_v46 }
  0x91   :  { %v327_v5 = vpack.c.bf16 %v289_v47, %v289_v47  ;;  %v421_v52 = vsel %vm367_vm4, %v410_v48, %v420_v49 }
  0x92   :  { %v414_v4 = vunpack.c.l.b16 %v325_v62  ;;  %v422_v6 = vsel %vm369_vm5, %v412_v63, %v421_v52 }
  0x93   :  { %v416_v7 = vunpack.c.l.b16 %v327_v5 }
  0x94   :  { %v423_v50 = vsel %vm371_vm6, %v414_v4, %v422_v6 }
  0x95   :  { %v424_v8 = vsel %vm373_vm7, %v416_v7, %v423_v50 }
  0x96   :  { %v432_v9 = vpack.c.b16 %v424_v8, %v424_v8 }
  0x98   :  { %894 = vmatmul.mubr.bf16.vlgmr.msra.gmra.mxu1 %v432_v9 }
 0x144   :  { %v854_v10 = vpop.f32.mrf.mxu0 }
 0x146   :  { %v856_v58 = vpop.f32.mrf.mxu0 }
 0x148   :  { %v858_v11 = vpop.f32.mrf.mxu0 }
 0x14a   :  { %v859_v12 = vpop.f32.mrf.mxu0 }
 0x158   :  { %v895_v51 = vpop.f32.mrf.mxu1 }
 0x159   :  { %v896_v59 = vadd.f32 %v895_v51, %v854_v10 }
 0x15a   :  { %v897_v13 = vpop.f32.mrf.mxu1 }
 0x15b   :  { %v996_v14 = vmul.f32 -1.442695, %v896_v59  ;;  %v898_v15 = vadd.f32 %v897_v13, %v856_v58 }
 0x15c   :  { %v899_v16 = vpop.f32.mrf.mxu1 }
 0x15d   :  { %1107 = vpow2.f32 %v996_v14  ;;  %v997_v17 = vmul.f32 -1.442695, %v898_v15 }
 0x15e   :  { %v900_v18 = vpop.f32.mrf.mxu1 }
 0x15f   :  { %1109 = vpow2.f32 %v997_v17 }
 0x16a   :  { %v1108_v55 = vpop.eup %1107 }
 0x16b   :  { %v908_v60 = vadd.f32 1.0, %v1108_v55 }
 0x16c   :  { %v1110_v56 = vpop.eup %1109 }
 0x16d   :  { %1111 = vrcp.f32 %v908_v60  ;;  %v909_v19 = vadd.f32 1.0, %v1110_v56 }
 0x16f   :  { %1113 = vrcp.f32 %v909_v19 }
 0x17a   :  { %v1112_v53 = vpop.eup %1111 }
 0x17b   :  { %914 = vst [vmem:[#allocation7] sm:$0xff] %v1112_v53 }
 0x17c   :  { %v1114_v61 = vpop.eup %1113 }
 0x17d   :  { %915 = vst [vmem:[#allocation7 + $0x8] sm:$0xff] %v1114_v61 }
 0x17e   :  { %1166 = shalt.err (!%p1163_p0)
}
 0x17f   :  { %925 = dma.vmem_to_hbm [thread:$0]  %s923_s1, 256, %s1356_s2, [#allocation4]  }
 0x180   :  { %1179 = dma.done.wait [#allocation4], 256  }
 0x181   :  { %1180 = vsyncadd [#allocation4], 4294967040 }
 0x182   :  { %929 = vsyncpa [#allocation3], 1 }
 0x183   :  { %930 = vsyncpa [#allocation6], 1 }
 0x184   :  { %931 = vsyncpa [#allocation4], 1 }

</bundles_post_ra>
